<compile_context>
chip_gen: v7x
topology: tpu7x:2x2x1
jax: 0.10.0
libtpu: 0.0.40
codegen_flags: <defaults>
</compile_context>

<pallas_src>
import functools

import jax
import jax.numpy as jnp
from jax import lax
from jax.experimental import pallas as pl
from jax.experimental.pallas import tpu as pltpu

LIMIT_A = -0.1
LIMIT_B = 1.1


# --------------------------------------------------------------------------
# kernel bodies
# --------------------------------------------------------------------------
def _exact_topk_mask(lsel, k, *, first_max=None):
    """Exactly-k top selection per row of `lsel` (TB, N); ties broken by lowest
    lane index (torch.topk-like).  Returns a float32 0/1 mask.

    k passes; each pass does one row-max and one row-min-of-index reduce (XLU)
    and marks a single lane.  `first_max`, if given, is the precomputed row max
    of `lsel` (reused from the softmax), which saves the pass-0 max reduce.
    """
    tb, n = lsel.shape
    lane_idx = lax.broadcasted_iota(jnp.int32, (tb, n), 1)
    neg_inf = jnp.float32(-jnp.inf)

    def mark_first_max_lane(sel, t):
        # lowest-index not-yet-selected lane whose value equals the current max t
        is_max = (lsel == t) & (sel == 0.0)
        first = jnp.min(jnp.where(is_max, lane_idx, n), axis=-1, keepdims=True)
        return jnp.where(lane_idx == first, 1.0, sel)

    sel = jnp.zeros((tb, n), jnp.float32)
    if first_max is None:
        first_max = jnp.max(lsel, axis=-1, keepdims=True)
    sel = mark_first_max_lane(sel, first_max)

    def body(_, sel):
        cur = jnp.where(sel > 0.0, neg_inf, lsel)
        t = jnp.max(cur, axis=-1, keepdims=True)
        return mark_first_max_lane(sel, t)

    # k is a small static int; unroll so the LLO scheduler sees the whole stream.
    return lax.fori_loop(0, k - 1, body, sel, unroll=True if k <= 16 else 8)


def _dds_core(logits, mask_ref, s_ref, *, k, largest, row_gate):
    """Shared hot path: softmax -> s (stored early) -> exact top-k mask."""
    # row-wise softmax over the flattened feature dim (dim=1 in torch)
    m = jnp.max(logits, axis=-1, keepdims=True)
    e = jnp.exp(logits - m)
    denom = jnp.sum(e, axis=-1, keepdims=True)

    # s = hardtanh(k * softmax * (limit_b - limit_a) + limit_a, 0, 1); softmax is
    # folded into a per-row scale (one less full-tile multiply).  Stored before
    # the serialized top-k loop so its writeback DMA overlaps it.
    scale = (k * (LIMIT_B - LIMIT_A)) / denom
    s = jnp.clip(e * scale + LIMIT_A, 0.0, 1.0)
    s_ref[...] = s.astype(s_ref.dtype)

    # torch.topk(z, k, dim=-1) + scatter: softmax is strictly monotone per row,
    # so select in *logits* space (no exp/div on the critical path, no fp32
    # softmax-underflow ties).  Exactly k lanes open per row.
    if largest:
        mask = _exact_topk_mask(logits, k, first_max=m)   # reuse softmax row max
    else:
        mask = _exact_topk_mask(-logits, k)
    if row_gate is not None:                               # open whole row w.p. factor_2
        mask = jnp.where(row_gate, 1.0, mask)
    mask_ref[...] = mask.astype(mask_ref.dtype)


def _dds_eval_kernel(x_ref, mask_ref, s_ref, *, k, inv_temp, largest):
    logits = x_ref[...].astype(jnp.float32) * inv_temp
    _dds_core(logits, mask_ref, s_ref, k=k, largest=largest, row_gate=None)


def _dds_train_kernel(x_ref, r_ref, gate_ref, mask_ref, s_ref, *, k, inv_temp,
                      noise_scale, factor_2, largest):
    u = x_ref[...].astype(jnp.float32)
    r = r_ref[...].astype(jnp.float32)
    # (factor * 4 * r + u) / temp folded into one fma + one mul
    logits = (u + noise_scale * r) * inv_temp
    row_gate = None
    if factor_2 > 0.0:
        row_gate = gate_ref[...] < jnp.float32(factor_2)   # (tb, 1) bool
    _dds_core(logits, mask_ref, s_ref, k=k, largest=largest, row_gate=row_gate)


# --------------------------------------------------------------------------
# wrapper
# --------------------------------------------------------------------------
def _round_up(x, m):
    return (x + m - 1) // m * m


def _vmem_limit_bytes():
    try:
        cap = getattr(pltpu.get_tpu_info(), "vmem_capacity_bytes", None)
        if cap:
            # ~3/4 of physical (v5e/v6e: 96 MiB, v7x: 48 MiB), leaves headroom
            # for Mosaic's internal scratch.
            return int(min(cap * 3 // 4, 96 * 1024 * 1024))
    except Exception:
        pass
    return 48 * 1024 * 1024


def _pick_row_tile(B, N, stream_bytes_per_elem):
    """Row-tile size: multiple of 8, sized so the double-buffered pipeline
    streams plus ~8 (tb, N) f32 in-kernel temporaries stay under ~24 MiB,
    capped so the grid keeps >= 2 (ideally 4) steps when the batch allows."""
    if B <= 8:
        return B                                  # single block == full dim
    per_row = N * (2 * stream_bytes_per_elem + 8 * 4)
    tb = (24 * 1024 * 1024 // per_row) // 8 * 8
    tb = max(8, min(int(tb), 512))
    if B >= 16:                                   # >= 2 steps (v7x: 2 TensorCores)
        tb = min(tb, _round_up(-(-B // 2), 8))
    tb = min(tb, max(128, _round_up(-(-B // 4), 8)))   # >= 4 steps unless tiles < 128 rows
    tb = min(tb, (B // 8) * 8)
    return max(int(tb), 8)
    # TODO(synk): add an N-tiled streaming softmax/top-k path for very large
    # C*H*W (the 8-row floor can exceed VMEM on v7x's 64 MiB per TensorCore).


def dynamic_data_selection_hard2v2(x, n_features_to_select, *,
                                   temperature=5.0 / 3.0, start_dim=1,
                                   largest=True, factor=0.1, factor_2=0.1,
                                   training=False, key=None,
                                   mask_dtype=None, s_dtype=None):
    """Forward pass of DynamicDataSelectionHard2v2.  Returns (mask, s).

    mask_dtype / s_dtype default to x.dtype (so bf16 inputs give bf16 outputs and
    ~33% less HBM traffic); pass jnp.bfloat16 explicitly for f32 inputs if the
    downstream consumer tolerates it (mask is exactly 0/1 either way).
    """
    k = int(n_features_to_select)
    assert k > 0

    x_shape = x.shape
    xf = x.reshape(x.shape[:start_dim] + (-1,)) if x.ndim > 2 else x
    assert xf.ndim == 2, "kernel supports flatten(start_dim) yielding a 2-D (B, N) slab"
    B, N = xf.shape
    assert k <= N, f"n_features_to_select={k} exceeds flattened feature dim {N}"
    # TODO(synk): pad N to a multiple of 128 (with -/+inf fill excluded from the
    # softmax/top-k) for lane-dense output stores when C*H*W % 128 != 0.

    mask_dtype = xf.dtype if mask_dtype is None else mask_dtype
    s_dtype = xf.dtype if s_dtype is None else s_dtype
    inv_temp = float(1.0 / temperature)
    x_bytes = jnp.dtype(xf.dtype).itemsize
    out_bytes = jnp.dtype(mask_dtype).itemsize + jnp.dtype(s_dtype).itemsize

    out_shape = (jax.ShapeDtypeStruct((B, N), mask_dtype),
                 jax.ShapeDtypeStruct((B, N), s_dtype))

    if training:
        assert key is not None, "training=True requires a PRNG key"
        kr, kg = jax.random.split(key)
        # TODO(synk): generate these in-kernel with pltpu.prng_seed/stateful_*
        # once interpret-mode support is not required (drops the (B, N) stream).
        r = jax.random.normal(kr, (B, N), dtype=xf.dtype)            # randn_like(u)
        gate_u = jax.random.uniform(kg, (B, 1), dtype=jnp.float32)   # rand((B, 1))
        tb = _pick_row_tile(B, N, 2 * x_bytes + out_bytes)
        kernel = functools.partial(
            _dds_train_kernel, k=k, inv_temp=inv_temp,
            noise_scale=float(4.0 * factor), factor_2=float(factor_2),
            largest=bool(largest))
        in_specs = [pl.BlockSpec((tb, N), lambda i: (i, 0)),
                    pl.BlockSpec((tb, N), lambda i: (i, 0)),
                    pl.BlockSpec((tb, 1), lambda i: (i, 0))]
        args = (xf, r, gate_u)
    else:
        tb = _pick_row_tile(B, N, x_bytes + out_bytes)
        kernel = functools.partial(
            _dds_eval_kernel, k=k, inv_temp=inv_temp, largest=bool(largest))
        in_specs = [pl.BlockSpec((tb, N), lambda i: (i, 0))]
        args = (xf,)

    grid = (-(-B // tb),)   # partial last block is fine: rows are independent
    out_specs = (pl.BlockSpec((tb, N), lambda i: (i, 0)),
                 pl.BlockSpec((tb, N), lambda i: (i, 0)))

    mask, s = pl.pallas_call(
        kernel,
        grid=grid,
        in_specs=in_specs,
        out_specs=out_specs,
        out_shape=out_shape,
        compiler_params=pltpu.CompilerParams(
            dimension_semantics=("parallel",),
            vmem_limit_bytes=_vmem_limit_bytes()),
    )(*args)

    if len(x_shape) > 2:
        mask = mask.reshape(x_shape)
        s = s.reshape(x_shape)
    return mask, s


# --------------------------------------------------------------------------
# self-test
# --------------------------------------------------------------------------
if __name__ == "__main__":
    key = jax.random.PRNGKey(0)
    kx, knoise = jax.random.split(key)

    B, C, H, W = 2, 4, 16, 16
    n_features = 8
    temperature = 5.0 / 3.0
    inv_temp = float(1.0 / temperature)
    x = jax.random.normal(kx, (B, C, H, W), dtype=jnp.float32)

    xf = x.reshape(B, -1)
    N = xf.shape[1]

    # ---- eval path (deterministic softmax, no row randomization) ----
    mask_e, s_e = dynamic_data_selection_hard2v2(x, n_features, training=False)
    jax.block_until_ready((mask_e, s_e))
    assert mask_e.shape == x.shape and s_e.shape == x.shape

    ref_logits = xf * inv_temp
    kth_ref = jnp.sort(ref_logits, axis=-1)[:, N - n_features][:, None]
    mask_ref = (ref_logits >= kth_ref).astype(jnp.float32)
    z_ref = jax.nn.softmax(ref_logits, axis=-1)
    s_ref = jnp.clip(n_features * z_ref * (LIMIT_B - LIMIT_A) + LIMIT_A, 0.0, 1.0)

    row_counts = mask_e.reshape(B, -1).sum(axis=-1)
    assert bool(jnp.all(row_counts == n_features)), row_counts
    assert bool(jnp.array_equal(mask_e.reshape(B, -1).astype(jnp.float32), mask_ref))
    assert bool(jnp.allclose(s_e.reshape(B, -1), s_ref, atol=2e-3, rtol=0.0))
    assert bool(jnp.all((s_e >= 0.0) & (s_e <= 1.0)))

    # ---- training path (concrete noise + random full-row gates) ----
    mask_t, s_t = dynamic_data_selection_hard2v2(
        x, n_features, training=True, key=knoise)
    jax.block_until_ready((mask_t, s_t))
    assert mask_t.shape == x.shape and s_t.shape == x.shape

    # replicate the wrapper's internal randomness for a reference
    kr_t, kg_t = jax.random.split(knoise)
    r_t = jax.random.normal(kr_t, (B, N), dtype=xf.dtype)
    gate_t = (jax.random.uniform(kg_t, (B, 1), dtype=jnp.float32) < 0.1).reshape(B)
    train_logits = (xf + 0.4 * r_t) * inv_temp
    z_t = jax.nn.softmax(train_logits, axis=-1)
    s_t_ref = jnp.clip(n_features * z_t * (LIMIT_B - LIMIT_A) + LIMIT_A, 0.0, 1.0)

    rc_t = mask_t.reshape(B, -1).sum(axis=-1)
    expected_counts = jnp.where(gate_t, N, n_features).astype(rc_t.dtype)
    assert bool(jnp.array_equal(rc_t, expected_counts)), (rc_t, expected_counts)
    assert bool(jnp.all((mask_t == 0.0) | (mask_t == 1.0)))
    assert bool(jnp.allclose(s_t.reshape(B, -1), s_t_ref, atol=2e-3, rtol=0.0))
    assert bool(jnp.all((s_t >= 0.0) & (s_t <= 1.0)))

    print("KERNEL_OK")
</pallas_src>

<mosaic_0001>
module attributes {stable_mosaic.version = 11 : i64} {
  func.func @_dds_eval_kernel(%arg0: i32, %arg1: memref<2x1024xf32, #tpu.memory_space<vmem>>, %arg2: memref<2x1024xf32, #tpu.memory_space<vmem>>, %arg3: memref<2x1024xf32, #tpu.memory_space<vmem>>) attributes {dimension_semantics = [#tpu.dimension_semantics<parallel>], iteration_bounds = array<i64: 1>, scalar_prefetch = 0 : i64, scratch_operands = 0 : i64, tpu.core_type = #tpu.core_type<tc>, window_params = [{transform_indices = @transform_0, window_bounds = array<i64: 2, 1024>}, {transform_indices = @transform_1, window_bounds = array<i64: 2, 1024>}, {transform_indices = @transform_2, window_bounds = array<i64: 2, 1024>}]} {
    %c0 = arith.constant 0 : index
    %c0_0 = arith.constant 0 : index
    %0 = vector.load %arg1[%c0, %c0_0] : memref<2x1024xf32, #tpu.memory_space<vmem>>, vector<2x1024xf32>
    %cst = arith.constant 6.000000e-01 : f32
    %1 = vector.broadcast %cst : f32 to vector<2x1024xf32>
    %2 = arith.mulf %0, %1 : vector<2x1024xf32>
    %cst_1 = arith.constant dense<0xFF800000> : vector<2xf32>
    %3 = vector.multi_reduction <maximumf>, %2, %cst_1 [1] : vector<2x1024xf32> to vector<2xf32>
    %4 = vector.shape_cast %3 : vector<2xf32> to vector<2x1xf32>
    %5 = vector.broadcast %4 : vector<2x1xf32> to vector<2x1024xf32>
    %6 = arith.subf %2, %5 : vector<2x1024xf32>
    %7 = math.exp %6 : vector<2x1024xf32>
    %cst_2 = arith.constant dense<0.000000e+00> : vector<2xf32>
    %8 = vector.multi_reduction <add>, %7, %cst_2 [1] : vector<2x1024xf32> to vector<2xf32>
    %9 = vector.shape_cast %8 : vector<2xf32> to vector<2x1xf32>
    %cst_3 = arith.constant 9.600000e+00 : f32
    %10 = vector.broadcast %cst_3 : f32 to vector<2x1xf32>
    %11 = arith.divf %10, %9 : vector<2x1xf32>
    %12 = vector.broadcast %11 : vector<2x1xf32> to vector<2x1024xf32>
    %13 = arith.mulf %7, %12 : vector<2x1024xf32>
    %cst_4 = arith.constant -1.000000e-01 : f32
    %14 = vector.broadcast %cst_4 : f32 to vector<2x1024xf32>
    %15 = arith.addf %13, %14 : vector<2x1024xf32>
    %cst_5 = arith.constant 0.000000e+00 : f32
    %cst_6 = arith.constant 1.000000e+00 : f32
    %16 = vector.broadcast %cst_5 : f32 to vector<2x1024xf32>
    %17 = arith.maximumf %16, %15 : vector<2x1024xf32>
    %18 = vector.broadcast %cst_6 : f32 to vector<2x1024xf32>
    %19 = arith.minimumf %18, %17 : vector<2x1024xf32>
    %c0_7 = arith.constant 0 : index
    %c0_8 = arith.constant 0 : index
    %20 = vector.load %arg3[%c0_7, %c0_8] : memref<2x1024xf32, #tpu.memory_space<vmem>>, vector<2x1024xf32>
    tpu.vector_store %arg3[%c0_7, %c0_8], %19 {strides = array<i32>} : memref<2x1024xf32, #tpu.memory_space<vmem>>, vector<2x1024xf32>,
    %21 = tpu.iota {dimensions = array<i32: 1>} : vector<2x1024xi32>
    %cst_9 = arith.constant 0.000000e+00 : f32
    %22 = vector.broadcast %cst_9 : f32 to vector<2x1024xf32>
    %23 = vector.broadcast %4 : vector<2x1xf32> to vector<2x1024xf32>
    %24 = arith.cmpf oeq, %2, %23 : vector<2x1024xf32>
    %cst_10 = arith.constant 0.000000e+00 : f32
    %25 = vector.broadcast %cst_10 : f32 to vector<2x1024xf32>
    %26 = arith.cmpf oeq, %22, %25 : vector<2x1024xf32>
    %27 = arith.andi %24, %26 : vector<2x1024xi1>
    %c1024_i32 = arith.constant 1024 : i32
    %28 = vector.broadcast %c1024_i32 : i32 to vector<2x1024xi32>
    %29 = arith.select %27, %21, %28 : vector<2x1024xi1>, vector<2x1024xi32>
    %cst_11 = arith.constant dense<2147483647> : vector<2xi32>
    %30 = vector.multi_reduction <minsi>, %29, %cst_11 [1] : vector<2x1024xi32> to vector<2xi32>
    %31 = vector.shape_cast %30 : vector<2xi32> to vector<2x1xi32>
    %32 = vector.broadcast %31 : vector<2x1xi32> to vector<2x1024xi32>
    %33 = arith.cmpi eq, %21, %32 : vector<2x1024xi32>
    %cst_12 = arith.constant 1.000000e+00 : f32
    %34 = vector.broadcast %cst_12 : f32 to vector<2x1024xf32>
    %35 = arith.select %33, %34, %22 : vector<2x1024xi1>, vector<2x1024xf32>
    %cst_13 = arith.constant 0xFF800000 : f32
    %c0_i32 = arith.constant 0 : i32
    %cst_14 = arith.constant 0.000000e+00 : f32
    %36 = vector.broadcast %cst_14 : f32 to vector<2x1024xf32>
    %37 = arith.cmpf ogt, %35, %36 : vector<2x1024xf32>
    %38 = vector.broadcast %cst_13 : f32 to vector<2x1024xf32>
    %39 = arith.select %37, %38, %2 : vector<2x1024xi1>, vector<2x1024xf32>
    %cst_15 = arith.constant dense<0xFF800000> : vector<2xf32>
    %40 = vector.multi_reduction <maximumf>, %39, %cst_15 [1] : vector<2x1024xf32> to vector<2xf32>
    %41 = vector.shape_cast %40 : vector<2xf32> to vector<2x1xf32>
    %42 = vector.broadcast %41 : vector<2x1xf32> to vector<2x1024xf32>
    %43 = arith.cmpf oeq, %2, %42 : vector<2x1024xf32>
    %cst_16 = arith.constant 0.000000e+00 : f32
    %44 = vector.broadcast %cst_16 : f32 to vector<2x1024xf32>
    %45 = arith.cmpf oeq, %35, %44 : vector<2x1024xf32>
    %46 = arith.andi %43, %45 : vector<2x1024xi1>
    %c1024_i32_17 = arith.constant 1024 : i32
    %47 = vector.broadcast %c1024_i32_17 : i32 to vector<2x1024xi32>
    %48 = arith.select %46, %21, %47 : vector<2x1024xi1>, vector<2x1024xi32>
    %cst_18 = arith.constant dense<2147483647> : vector<2xi32>
    %49 = vector.multi_reduction <minsi>, %48, %cst_18 [1] : vector<2x1024xi32> to vector<2xi32>
    %50 = vector.shape_cast %49 : vector<2xi32> to vector<2x1xi32>
    %51 = vector.broadcast %50 : vector<2x1xi32> to vector<2x1024xi32>
    %52 = arith.cmpi eq, %21, %51 : vector<2x1024xi32>
    %cst_19 = arith.constant 1.000000e+00 : f32
    %53 = vector.broadcast %cst_19 : f32 to vector<2x1024xf32>
    %54 = arith.select %52, %53, %35 : vector<2x1024xi1>, vector<2x1024xf32>
    %c1_i32 = arith.constant 1 : i32
    %cst_20 = arith.constant 0.000000e+00 : f32
    %55 = vector.broadcast %cst_20 : f32 to vector<2x1024xf32>
    %56 = arith.cmpf ogt, %54, %55 : vector<2x1024xf32>
    %57 = vector.broadcast %cst_13 : f32 to vector<2x1024xf32>
    %58 = arith.select %56, %57, %2 : vector<2x1024xi1>, vector<2x1024xf32>
    %cst_21 = arith.constant dense<0xFF800000> : vector<2xf32>
    %59 = vector.multi_reduction <maximumf>, %58, %cst_21 [1] : vector<2x1024xf32> to vector<2xf32>
    %60 = vector.shape_cast %59 : vector<2xf32> to vector<2x1xf32>
    %61 = vector.broadcast %60 : vector<2x1xf32> to vector<2x1024xf32>
    %62 = arith.cmpf oeq, %2, %61 : vector<2x1024xf32>
    %cst_22 = arith.constant 0.000000e+00 : f32
    %63 = vector.broadcast %cst_22 : f32 to vector<2x1024xf32>
    %64 = arith.cmpf oeq, %54, %63 : vector<2x1024xf32>
    %65 = arith.andi %62, %64 : vector<2x1024xi1>
    %c1024_i32_23 = arith.constant 1024 : i32
    %66 = vector.broadcast %c1024_i32_23 : i32 to vector<2x1024xi32>
    %67 = arith.select %65, %21, %66 : vector<2x1024xi1>, vector<2x1024xi32>
    %cst_24 = arith.constant dense<2147483647> : vector<2xi32>
    %68 = vector.multi_reduction <minsi>, %67, %cst_24 [1] : vector<2x1024xi32> to vector<2xi32>
    %69 = vector.shape_cast %68 : vector<2xi32> to vector<2x1xi32>
    %70 = vector.broadcast %69 : vector<2x1xi32> to vector<2x1024xi32>
    %71 = arith.cmpi eq, %21, %70 : vector<2x1024xi32>
    %cst_25 = arith.constant 1.000000e+00 : f32
    %72 = vector.broadcast %cst_25 : f32 to vector<2x1024xf32>
    %73 = arith.select %71, %72, %54 : vector<2x1024xi1>, vector<2x1024xf32>
    %c2_i32 = arith.constant 2 : i32
    %cst_26 = arith.constant 0.000000e+00 : f32
    %74 = vector.broadcast %cst_26 : f32 to vector<2x1024xf32>
    %75 = arith.cmpf ogt, %73, %74 : vector<2x1024xf32>
    %76 = vector.broadcast %cst_13 : f32 to vector<2x1024xf32>
    %77 = arith.select %75, %76, %2 : vector<2x1024xi1>, vector<2x1024xf32>
    %cst_27 = arith.constant dense<0xFF800000> : vector<2xf32>
    %78 = vector.multi_reduction <maximumf>, %77, %cst_27 [1] : vector<2x1024xf32> to vector<2xf32>
    %79 = vector.shape_cast %78 : vector<2xf32> to vector<2x1xf32>
    %80 = vector.broadcast %79 : vector<2x1xf32> to vector<2x1024xf32>
    %81 = arith.cmpf oeq, %2, %80 : vector<2x1024xf32>
    %cst_28 = arith.constant 0.000000e+00 : f32
    %82 = vector.broadcast %cst_28 : f32 to vector<2x1024xf32>
    %83 = arith.cmpf oeq, %73, %82 : vector<2x1024xf32>
    %84 = arith.andi %81, %83 : vector<2x1024xi1>
    %c1024_i32_29 = arith.constant 1024 : i32
    %85 = vector.broadcast %c1024_i32_29 : i32 to vector<2x1024xi32>
    %86 = arith.select %84, %21, %85 : vector<2x1024xi1>, vector<2x1024xi32>
    %cst_30 = arith.constant dense<2147483647> : vector<2xi32>
    %87 = vector.multi_reduction <minsi>, %86, %cst_30 [1] : vector<2x1024xi32> to vector<2xi32>
    %88 = vector.shape_cast %87 : vector<2xi32> to vector<2x1xi32>
    %89 = vector.broadcast %88 : vector<2x1xi32> to vector<2x1024xi32>
    %90 = arith.cmpi eq, %21, %89 : vector<2x1024xi32>
    %cst_31 = arith.constant 1.000000e+00 : f32
    %91 = vector.broadcast %cst_31 : f32 to vector<2x1024xf32>
    %92 = arith.select %90, %91, %73 : vector<2x1024xi1>, vector<2x1024xf32>
    %c3_i32 = arith.constant 3 : i32
    %cst_32 = arith.constant 0.000000e+00 : f32
    %93 = vector.broadcast %cst_32 : f32 to vector<2x1024xf32>
    %94 = arith.cmpf ogt, %92, %93 : vector<2x1024xf32>
    %95 = vector.broadcast %cst_13 : f32 to vector<2x1024xf32>
    %96 = arith.select %94, %95, %2 : vector<2x1024xi1>, vector<2x1024xf32>
    %cst_33 = arith.constant dense<0xFF800000> : vector<2xf32>
    %97 = vector.multi_reduction <maximumf>, %96, %cst_33 [1] : vector<2x1024xf32> to vector<2xf32>
    %98 = vector.shape_cast %97 : vector<2xf32> to vector<2x1xf32>
    %99 = vector.broadcast %98 : vector<2x1xf32> to vector<2x1024xf32>
    %100 = arith.cmpf oeq, %2, %99 : vector<2x1024xf32>
    %cst_34 = arith.constant 0.000000e+00 : f32
    %101 = vector.broadcast %cst_34 : f32 to vector<2x1024xf32>
    %102 = arith.cmpf oeq, %92, %101 : vector<2x1024xf32>
    %103 = arith.andi %100, %102 : vector<2x1024xi1>
    %c1024_i32_35 = arith.constant 1024 : i32
    %104 = vector.broadcast %c1024_i32_35 : i32 to vector<2x1024xi32>
    %105 = arith.select %103, %21, %104 : vector<2x1024xi1>, vector<2x1024xi32>
    %cst_36 = arith.constant dense<2147483647> : vector<2xi32>
    %106 = vector.multi_reduction <minsi>, %105, %cst_36 [1] : vector<2x1024xi32> to vector<2xi32>
    %107 = vector.shape_cast %106 : vector<2xi32> to vector<2x1xi32>
    %108 = vector.broadcast %107 : vector<2x1xi32> to vector<2x1024xi32>
    %109 = arith.cmpi eq, %21, %108 : vector<2x1024xi32>
    %cst_37 = arith.constant 1.000000e+00 : f32
    %110 = vector.broadcast %cst_37 : f32 to vector<2x1024xf32>
    %111 = arith.select %109, %110, %92 : vector<2x1024xi1>, vector<2x1024xf32>
    %c4_i32 = arith.constant 4 : i32
    %cst_38 = arith.constant 0.000000e+00 : f32
    %112 = vector.broadcast %cst_38 : f32 to vector<2x1024xf32>
    %113 = arith.cmpf ogt, %111, %112 : vector<2x1024xf32>
    %114 = vector.broadcast %cst_13 : f32 to vector<2x1024xf32>
    %115 = arith.select %113, %114, %2 : vector<2x1024xi1>, vector<2x1024xf32>
    %cst_39 = arith.constant dense<0xFF800000> : vector<2xf32>
    %116 = vector.multi_reduction <maximumf>, %115, %cst_39 [1] : vector<2x1024xf32> to vector<2xf32>
    %117 = vector.shape_cast %116 : vector<2xf32> to vector<2x1xf32>
    %118 = vector.broadcast %117 : vector<2x1xf32> to vector<2x1024xf32>
    %119 = arith.cmpf oeq, %2, %118 : vector<2x1024xf32>
    %cst_40 = arith.constant 0.000000e+00 : f32
    %120 = vector.broadcast %cst_40 : f32 to vector<2x1024xf32>
    %121 = arith.cmpf oeq, %111, %120 : vector<2x1024xf32>
    %122 = arith.andi %119, %121 : vector<2x1024xi1>
    %c1024_i32_41 = arith.constant 1024 : i32
    %123 = vector.broadcast %c1024_i32_41 : i32 to vector<2x1024xi32>
    %124 = arith.select %122, %21, %123 : vector<2x1024xi1>, vector<2x1024xi32>
    %cst_42 = arith.constant dense<2147483647> : vector<2xi32>
    %125 = vector.multi_reduction <minsi>, %124, %cst_42 [1] : vector<2x1024xi32> to vector<2xi32>
    %126 = vector.shape_cast %125 : vector<2xi32> to vector<2x1xi32>
    %127 = vector.broadcast %126 : vector<2x1xi32> to vector<2x1024xi32>
    %128 = arith.cmpi eq, %21, %127 : vector<2x1024xi32>
    %cst_43 = arith.constant 1.000000e+00 : f32
    %129 = vector.broadcast %cst_43 : f32 to vector<2x1024xf32>
    %130 = arith.select %128, %129, %111 : vector<2x1024xi1>, vector<2x1024xf32>
    %c5_i32 = arith.constant 5 : i32
    %cst_44 = arith.constant 0.000000e+00 : f32
    %131 = vector.broadcast %cst_44 : f32 to vector<2x1024xf32>
    %132 = arith.cmpf ogt, %130, %131 : vector<2x1024xf32>
    %133 = vector.broadcast %cst_13 : f32 to vector<2x1024xf32>
    %134 = arith.select %132, %133, %2 : vector<2x1024xi1>, vector<2x1024xf32>
    %cst_45 = arith.constant dense<0xFF800000> : vector<2xf32>
    %135 = vector.multi_reduction <maximumf>, %134, %cst_45 [1] : vector<2x1024xf32> to vector<2xf32>
    %136 = vector.shape_cast %135 : vector<2xf32> to vector<2x1xf32>
    %137 = vector.broadcast %136 : vector<2x1xf32> to vector<2x1024xf32>
    %138 = arith.cmpf oeq, %2, %137 : vector<2x1024xf32>
    %cst_46 = arith.constant 0.000000e+00 : f32
    %139 = vector.broadcast %cst_46 : f32 to vector<2x1024xf32>
    %140 = arith.cmpf oeq, %130, %139 : vector<2x1024xf32>
    %141 = arith.andi %138, %140 : vector<2x1024xi1>
    %c1024_i32_47 = arith.constant 1024 : i32
    %142 = vector.broadcast %c1024_i32_47 : i32 to vector<2x1024xi32>
    %143 = arith.select %141, %21, %142 : vector<2x1024xi1>, vector<2x1024xi32>
    %cst_48 = arith.constant dense<2147483647> : vector<2xi32>
    %144 = vector.multi_reduction <minsi>, %143, %cst_48 [1] : vector<2x1024xi32> to vector<2xi32>
    %145 = vector.shape_cast %144 : vector<2xi32> to vector<2x1xi32>
    %146 = vector.broadcast %145 : vector<2x1xi32> to vector<2x1024xi32>
    %147 = arith.cmpi eq, %21, %146 : vector<2x1024xi32>
    %cst_49 = arith.constant 1.000000e+00 : f32
    %148 = vector.broadcast %cst_49 : f32 to vector<2x1024xf32>
    %149 = arith.select %147, %148, %130 : vector<2x1024xi1>, vector<2x1024xf32>
    %c6_i32 = arith.constant 6 : i32
    %cst_50 = arith.constant 0.000000e+00 : f32
    %150 = vector.broadcast %cst_50 : f32 to vector<2x1024xf32>
    %151 = arith.cmpf ogt, %149, %150 : vector<2x1024xf32>
    %152 = vector.broadcast %cst_13 : f32 to vector<2x1024xf32>
    %153 = arith.select %151, %152, %2 : vector<2x1024xi1>, vector<2x1024xf32>
    %cst_51 = arith.constant dense<0xFF800000> : vector<2xf32>
    %154 = vector.multi_reduction <maximumf>, %153, %cst_51 [1] : vector<2x1024xf32> to vector<2xf32>
    %155 = vector.shape_cast %154 : vector<2xf32> to vector<2x1xf32>
    %156 = vector.broadcast %155 : vector<2x1xf32> to vector<2x1024xf32>
    %157 = arith.cmpf oeq, %2, %156 : vector<2x1024xf32>
    %cst_52 = arith.constant 0.000000e+00 : f32
    %158 = vector.broadcast %cst_52 : f32 to vector<2x1024xf32>
    %159 = arith.cmpf oeq, %149, %158 : vector<2x1024xf32>
    %160 = arith.andi %157, %159 : vector<2x1024xi1>
    %c1024_i32_53 = arith.constant 1024 : i32
    %161 = vector.broadcast %c1024_i32_53 : i32 to vector<2x1024xi32>
    %162 = arith.select %160, %21, %161 : vector<2x1024xi1>, vector<2x1024xi32>
    %cst_54 = arith.constant dense<2147483647> : vector<2xi32>
    %163 = vector.multi_reduction <minsi>, %162, %cst_54 [1] : vector<2x1024xi32> to vector<2xi32>
    %164 = vector.shape_cast %163 : vector<2xi32> to vector<2x1xi32>
    %165 = vector.broadcast %164 : vector<2x1xi32> to vector<2x1024xi32>
    %166 = arith.cmpi eq, %21, %165 : vector<2x1024xi32>
    %cst_55 = arith.constant 1.000000e+00 : f32
    %167 = vector.broadcast %cst_55 : f32 to vector<2x1024xf32>
    %168 = arith.select %166, %167, %149 : vector<2x1024xi1>, vector<2x1024xf32>
    %c0_56 = arith.constant 0 : index
    %c0_57 = arith.constant 0 : index
    %169 = vector.load %arg2[%c0_56, %c0_57] : memref<2x1024xf32, #tpu.memory_space<vmem>>, vector<2x1024xf32>
    tpu.vector_store %arg2[%c0_56, %c0_57], %168 {strides = array<i32>} : memref<2x1024xf32, #tpu.memory_space<vmem>>, vector<2x1024xf32>,
    return
  }
  func.func @transform_0(%arg0: i32) -> (i32, i32) {
    %c0_i32 = arith.constant 0 : i32
    %c0_i32_0 = arith.constant 0 : i32
    return %arg0, %c0_i32 : i32, i32
  }
  func.func @transform_1(%arg0: i32) -> (i32, i32) {
    %c0_i32 = arith.constant 0 : i32
    %c0_i32_0 = arith.constant 0 : i32
    return %arg0, %c0_i32 : i32, i32
  }
  func.func @transform_2(%arg0: i32) -> (i32, i32) {
    %c0_i32 = arith.constant 0 : i32
    %c0_i32_0 = arith.constant 0 : i32
    return %arg0, %c0_i32 : i32, i32
  }
}

</mosaic_0001>

<bundles_post_ra>
// kernel: tpu_custom_call.1
= control target key start
LH: loop header
LB: loop body
LE: loop exit
PB: predicated region body
PF: predicated region fallthrough
CT: control target
= control target key end

     0   :  { %8 = vsyncpa [#allocation3], 0  ;;  %s2653_s0 = inlined_call_operand.hbm [shape: f32[2,1024], index: 0, kind: input, shape index: {}]   ;;  %s2654_s1 = inlined_call_operand.hbm [shape: f32[2,1024], index: 1, kind: output, shape index: {0}]   ;;  %s2655_s2 = inlined_call_operand.hbm [shape: f32[2,1024], index: 2, kind: output, shape index: {1}]  }
   0x1   :  { %9 = vsyncpa [#allocation4], 0 }
   0x2   :  { %10 = vsyncpa [#allocation7], 0  ;;  %s1785_s9 = smov [#allocation2]   ;;  %s1713_s13 = scalar_lea.hbm %s2653_s0, 256 }
   0x3   :  { %s17_s10 = sshll.u32 %s1785_s9, 4  ;;  %p1714_p0 = scmp.ne.s32.totalorder %s2653_s0, %s1713_s13  ;;  %s18_s10 = int_to_ptr.vmem [resolvable:$true] %s17_s10 }
   0x4   :  { %p1717_p1 = scmp.lt.u32.totalorder %s1713_s13, %s2653_s0 }
   0x6   :  { %p1719_p2 = pnand %p1717_p1, %p1714_p0 }
   0x8   :  { %1722 = shalt.err (!%p1719_p2)
}
   0x9   :  { %s1723_s18 = scalar_lea.vmem %s18_s10, 256  ;;  %p1728_p4 = scmp.lt.s32.totalorder %s18_s10, %s18_s10 }
   0xa   :  { %p1724_p3 = scmp.ne.s32.totalorder %s18_s10, %s1723_s18  ;;  %p1729_p5 = scmp.lt.s32.totalorder %s1723_s18, %s1723_s18 }
   0xc   :  { %p1730_p6 = por %p1729_p5, %p1728_p4 }
   0xe   :  { %p1731_p7 = pnand %p1730_p6, %p1724_p3 }
  0x10   :  { %1734 = shalt.err (!%p1731_p7)
}
  0x11   :  { %20 = dma.hbm_to_vmem [thread:$0]  %s2653_s0, 256, %s18_s10, [#allocation3]  }
  0x12   :  { %1779 = dma.done.wait [#allocation3], 256  }
  0x13   :  { %1780 = vsyncadd [#allocation3], 4294967040  ;;  %v34_v0 = vlaneseq  ;;  %v1786_v1 = vmov 1983009808   ;;  %v24_v6 = vld [vmem:[#allocation2] sm:$0xff]  ;;  %v25_v7 = vld [vmem:[#allocation2 + $0x8] sm:$0xff] }
  0x14   :  { %v32_v2 = vunpack.c.l.s4 %v1786_v1  ;;  %v1821_v8 = vmul.f32 0.6, %v24_v6  ;;  %v1823_v9 = vmul.f32 0.6, %v25_v7  ;;  %vm72_vm0 = vcmask 1041408   ;;  %s1790_s0 = smov [#allocation6]  }
  0x15   :  { %v35_v3 = vshrl.u32 %v34_v0, 7  ;;  %v1875_v35 = vand.u32 127, %v34_v0  ;;  %v1787_v43 = vmov 269488144   ;;  %s1687_s21 = sshll.u32 %s1790_s0, 4  ;;  %s1688_s21 = int_to_ptr.vmem [resolvable:$true] %s1687_s21 }
  0x16   :  { %v33_v4 = vunpack.c.0.s8 %v32_v2  ;;  %v30_v10 = vcombine.high %v1821_v8, %v1821_v8  ;;  %v47_v12 = vcombine.high %v1823_v9, %v1823_v9  ;;  %v92_v44 = vunpack.c.l.s4 %v1787_v43  ;;  %s1735_s22 = scalar_lea.vmem %s1688_s21, 256  ;;  %p1740_p9 = scmp.lt.s32.totalorder %s1688_s21, %s1688_s21 }
  0x17   :  { %v1878_v36 = vadd.s32 128, %v1875_v35  ;;  %v1881_v37 = vadd.s32 256, %v1875_v35  ;;  %v1884_v38 = vadd.s32 384, %v1875_v35  ;;  %v1887_v39 = vadd.s32 512, %v1875_v35  ;;  %p1736_p8 = scmp.ne.s32.totalorder %s1688_s21, %s1735_s22  ;;  %p1741_p10 = scmp.lt.s32.totalorder %s1735_s22, %s1735_s22 }
  0x18   :  { %v1819_v5 = vsub.s32 %v33_v4, %v35_v3  ;;  %v1890_v40 = vadd.s32 640, %v1875_v35  ;;  %v1893_v41 = vadd.s32 768, %v1875_v35  ;;  %v1896_v42 = vadd.s32 896, %v1875_v35 }
  0x19   :  { %v201_v45 = vcombine.low %v1875_v35, %v1878_v36  ;;  %v202_v46 = vcombine.low %v1881_v37, %v1884_v38  ;;  %v93_v49 = vunpack.c.0.s8 %v92_v44  ;;  %p1742_p11 = por %p1741_p10, %p1740_p9 }
  0x1a   :  { %v1829_v11 = vrot.slane %v1821_v8, %v1819_v5  ;;  %v1835_v13 = vrot.slane %v1823_v9, %v1819_v5  ;;  %v1838_v14 = vrot.slane %v30_v10, %v1819_v5  ;;  %v1845_v16 = vrot.slane %v47_v12, %v1819_v5 }
  0x1b   :  { %v218_v47 = vcombine.low %v1887_v39, %v1890_v40  ;;  %v219_v48 = vcombine.low %v1893_v41, %v1896_v42  ;;  %v209_v50 = vrot.slane %v201_v45, %v1819_v5  ;;  %v216_v51 = vrot.slane %v202_v46, %v1819_v5  ;;  %p1743_p12 = pnand %p1742_p11, %p1736_p8 }
  0x1c   :  { %v1842_v15 = vcombine.high %v1829_v11, %v1829_v11  ;;  %v1849_v17 = vcombine.high %v1835_v13, %v1835_v13  ;;  %v73_v18 = vsel %vm72_vm0, %v1829_v11, -inf  ;;  %v77_v19 = vsel %vm72_vm0, %v1835_v13, -inf }
  0x1d   :  { %v1857_v20 = vcombine.high %v1838_v14, %v1838_v14  ;;  %v1861_v21 = vcombine.high %v1845_v16, %v1845_v16  ;;  %v75_v23 = vsel %vm72_vm0, %v1838_v14, -inf  ;;  %v78_v24 = vmax.f32 %v73_v18, %v77_v19 }
  0x1e   :  { %v74_v22 = vsel %vm72_vm0, %v1842_v15, -inf  ;;  %v79_v25 = vsel %vm72_vm0, %v1849_v17, -inf  ;;  %v81_v26 = vsel %vm72_vm0, %v1845_v16, -inf  ;;  %v226_v52 = vrot.slane %v218_v47, %v1819_v5 }
  0x1f   :  { %v76_v27 = vsel %vm72_vm0, %v1857_v20, -inf  ;;  %v80_v28 = vmax.f32 %v74_v22, %v79_v25  ;;  %v82_v29 = vmax.f32 %v75_v23, %v81_v26  ;;  %v83_v30 = vsel %vm72_vm0, %v1861_v21, -inf }
  0x20   :  { %v84_v31 = vmax.f32 %v76_v27, %v83_v30  ;;  %v233_v53 = vrot.slane %v219_v48, %v1819_v5  ;;  %v1910_v54 = vsub.s32 %v93_v49, %v35_v3  ;;  %v1912_v55 = vcombine.low %v209_v50, %v216_v51 }
  0x21   :  { %v85_v32 = vmax.f32 %v78_v24, %v80_v28 }
  0x22   :  { %v86_v33 = vmax.f32 %v82_v29, %v84_v31  ;;  %v1914_v56 = vcombine.low %v226_v52, %v233_v53  ;;  %v1788_v52 = vmov 0.0  }
  0x24   :  { %v87_v34 = vmax.f32 %v85_v32, %v86_v33 }
  0x26   :  { %88 = vmax.xlane.f32.xlu0 %v87_v34 }
  0xb3   :  { %v89_v57 = vpop.xlane.xlu0 %88 }
  0xb4   :  { %v1917_v58 = vrot.slane %v89_v57, %v1910_v54 }
  0xb6   :  { %vm196_vm1 = vcmp.eq.f32.partialorder %v1821_v8, %v1917_v58  ;;  %vm197_vm2 = vcmp.eq.f32.partialorder %v1823_v9, %v1917_v58 }
  0xb7   :  { %v235_v59 = vsel %vm196_vm1, %v1912_v55, 1024  ;;  %v236_v60 = vsel %vm197_vm2, %v1914_v56, 1024 }
  0xb8   :  { %v237_v61 = vcombine.high %v235_v59, %v235_v59  ;;  %v244_v62 = vrot.slane %v235_v59, %v1819_v5  ;;  %v254_v63 = vcombine.high %v236_v60, %v236_v60  ;;  %v261_v0 = vrot.slane %v236_v60, %v1819_v5 }
  0xba   :  { %v251_v1 = vrot.slane %v237_v61, %v1819_v5  ;;  %v252_v2 = vcombine.high %v244_v62, %v244_v62  ;;  %v271_v3 = vsel %vm72_vm0, %v244_v62, 2147483647  ;;  %v268_v4 = vrot.slane %v254_v63, %v1819_v5 }
  0xbb   :  { %v269_v6 = vcombine.high %v261_v0, %v261_v0  ;;  %v275_v7 = vsel %vm72_vm0, %v261_v0, 2147483647 }
  0xbc   :  { %v253_v10 = vcombine.high %v251_v1, %v251_v1  ;;  %v272_v12 = vsel %vm72_vm0, %v252_v2, 2147483647  ;;  %v273_v18 = vsel %vm72_vm0, %v251_v1, 2147483647  ;;  %vm276_vm3 = vcmp.lt.s32.totalorder %v271_v3, %v275_v7 }
  0xbd   :  { %v270_v19 = vcombine.high %v268_v4, %v268_v4  ;;  %v278_v22 = vsel %vm72_vm0, %v269_v6, 2147483647  ;;  %v281_v23 = vsel %vm72_vm0, %v268_v4, 2147483647  ;;  %v277_v25 = vsel %vm276_vm3, %v271_v3, %v275_v7 }
  0xbe   :  { %v274_v24 = vsel %vm72_vm0, %v253_v10, 2147483647  ;;  %vm279_vm4 = vcmp.lt.s32.totalorder %v272_v12, %v278_v22  ;;  %vm282_vm5 = vcmp.lt.s32.totalorder %v273_v18, %v281_v23 }
  0xbf   :  { %v280_v26 = vsel %vm279_vm4, %v272_v12, %v278_v22  ;;  %v284_v27 = vsel %vm72_vm0, %v270_v19, 2147483647  ;;  %v283_v28 = vsel %vm282_vm5, %v273_v18, %v281_v23 }
  0xc0   :  { %vm285_vm6 = vcmp.lt.s32.totalorder %v274_v24, %v284_v27  ;;  %vm287_vm7 = vcmp.lt.s32.totalorder %v277_v25, %v280_v26 }
  0xc1   :  { %v286_v29 = vsel %vm285_vm6, %v274_v24, %v284_v27  ;;  %v288_v30 = vsel %vm287_vm7, %v277_v25, %v280_v26 }
  0xc2   :  { %vm289_vm8 = vcmp.lt.s32.totalorder %v283_v28, %v286_v29 }
  0xc3   :  { %v290_v31 = vsel %vm289_vm8, %v283_v28, %v286_v29 }
  0xc4   :  { %vm291_vm9 = vcmp.lt.s32.totalorder %v288_v30, %v290_v31 }
  0xc5   :  { %v292_v32 = vsel %vm291_vm9, %v288_v30, %v290_v31 }
  0xc6   :  { %v294_v33 = vshra.s32 %v292_v32, 16  ;;  %v293_v43 = vand.u32 65535, %v292_v32 }
  0xc8   :  { %v296_v34 = vcvt.s32.f32 %v294_v33  ;;  %v295_v45 = vcvt.s32.f32 %v293_v43  ;;  %v1789_v43 = vmov 0  }
  0xca   :  { %297 = vmin.xlane.f32.xlu0 %v296_v34 }
 0x157   :  { %v298_v44 = vpop.xlane.xlu0 %297 }
 0x158   :  { %vm299_vm10 = vcmp.eq.f32.partialorder %v296_v34, %v298_v44  ;;  %v304_v47 = vcvt.f32.s32 %v298_v44 }
 0x159   :  { %v300_v46 = vsel %vm299_vm10, %v295_v45, inf }
 0x15a   :  { %301 = vmin.xlane.f32.xlu1 %v300_v46  ;;  %v305_v49 = vshll.u32 %v304_v47, 16 }
 0x1e7   :  { %v302_v48 = vpop.xlane.xlu1 %301 }
 0x1e8   :  { %v303_v50 = vcvt.f32.s32 %v302_v48 }
 0x1ea   :  { %v306_v51 = vadd.s32 %v305_v49, %v303_v50 }
 0x1ec   :  { %vm307_vm11 = vcmp.eq.s32.totalorder %v1875_v35, %v306_v51  ;;  %vm308_vm12 = vcmp.eq.s32.totalorder %v1878_v36, %v306_v51  ;;  %vm309_vm13 = vcmp.eq.s32.totalorder %v1881_v37, %v306_v51  ;;  %vm310_vm14 = vcmp.eq.s32.totalorder %v1884_v38, %v306_v51 }
 0x1ed   :  { %vm311_vm15 = vcmp.eq.s32.totalorder %v1887_v39, %v306_v51  ;;  %vm312_vm1 = vcmp.eq.s32.totalorder %v1890_v40, %v306_v51  ;;  %vm313_vm2 = vcmp.eq.s32.totalorder %v1893_v41, %v306_v51  ;;  %vm314_vm3 = vcmp.eq.s32.totalorder %v1896_v42, %v306_v51 }
 0x1ee   :  { %v1945_v53 = vsel %vm307_vm11, 1.0, %v1788_v52  ;;  %v1947_v57 = vsel %vm308_vm12, 1.0, %v1788_v52  ;;  %v1949_v59 = vsel %vm309_vm13, 1.0, %v1788_v52  ;;  %v1951_v60 = vsel %vm310_vm14, 1.0, %v1788_v52 }
 0x1ef   :  { %v1953_v61 = vsel %vm311_vm15, 1.0, %v1788_v52  ;;  %v1955_v62 = vsel %vm312_vm1, 1.0, %v1788_v52  ;;  %v1957_v63 = vsel %vm313_vm2, 1.0, %v1788_v52  ;;  %v1959_v0 = vsel %vm314_vm3, 1.0, %v1788_v52 }
 0x1f0   :  { %vm323_vm4 = vcmp.gt.f32.partialorder %v1945_v53, 0.0  ;;  %vm324_vm5 = vcmp.gt.f32.partialorder %v1947_v57, 0.0  ;;  %vm325_vm6 = vcmp.gt.f32.partialorder %v1949_v59, 0.0  ;;  %vm326_vm7 = vcmp.gt.f32.partialorder %v1951_v60, 0.0 }
 0x1f1   :  { %vm327_vm8 = vcmp.gt.f32.partialorder %v1953_v61, 0.0  ;;  %vm328_vm9 = vcmp.gt.f32.partialorder %v1955_v62, 0.0  ;;  %vm329_vm10 = vcmp.gt.f32.partialorder %v1957_v63, 0.0  ;;  %vm330_vm11 = vcmp.gt.f32.partialorder %v1959_v0, 0.0 }
 0x1f2   :  { %v331_v1 = vsel %vm323_vm4, -inf, %v1829_v11  ;;  %v332_v2 = vsel %vm324_vm5, -inf, %v1842_v15  ;;  %v333_v3 = vsel %vm325_vm6, -inf, %v1838_v14  ;;  %v334_v4 = vsel %vm326_vm7, -inf, %v1857_v20 }
 0x1f3   :  { %v335_v6 = vsel %vm327_vm8, -inf, %v1835_v13  ;;  %v336_v7 = vsel %vm328_vm9, -inf, %v1849_v17  ;;  %v337_v10 = vsel %vm329_vm10, -inf, %v1845_v16  ;;  %v338_v12 = vsel %vm330_vm11, -inf, %v1861_v21 }
 0x1f4   :  { %v339_v18 = vsel %vm72_vm0, %v331_v1, -inf  ;;  %v340_v19 = vsel %vm72_vm0, %v332_v2, -inf  ;;  %v341_v22 = vsel %vm72_vm0, %v333_v3, -inf  ;;  %v342_v23 = vsel %vm72_vm0, %v334_v4, -inf }
 0x1f5   :  { %v343_v24 = vsel %vm72_vm0, %v335_v6, -inf  ;;  %v345_v25 = vsel %vm72_vm0, %v336_v7, -inf  ;;  %v347_v26 = vsel %vm72_vm0, %v337_v10, -inf  ;;  %v349_v27 = vsel %vm72_vm0, %v338_v12, -inf }
 0x1f6   :  { %v344_v28 = vmax.f32 %v339_v18, %v343_v24  ;;  %v346_v29 = vmax.f32 %v340_v19, %v345_v25  ;;  %v348_v30 = vmax.f32 %v341_v22, %v347_v26  ;;  %v350_v31 = vmax.f32 %v342_v23, %v349_v27 }
 0x1f7   :  { %vm367_vm12 = vcmp.eq.f32.partialorder %v1945_v53, 0.0  ;;  %vm368_vm13 = vcmp.eq.f32.partialorder %v1947_v57, 0.0  ;;  %vm369_vm14 = vcmp.eq.f32.partialorder %v1949_v59, 0.0  ;;  %vm370_vm15 = vcmp.eq.f32.partialorder %v1951_v60, 0.0 }
 0x1f8   :  { %v351_v32 = vmax.f32 %v344_v28, %v346_v29  ;;  %v352_v33 = vmax.f32 %v348_v30, %v350_v31  ;;  %vm371_vm1 = vcmp.eq.f32.partialorder %v1953_v61, 0.0  ;;  %vm372_vm2 = vcmp.eq.f32.partialorder %v1955_v62, 0.0 }
 0x1f9   :  { %vm373_vm3 = vcmp.eq.f32.partialorder %v1957_v63, 0.0  ;;  %vm374_vm4 = vcmp.eq.f32.partialorder %v1959_v0, 0.0  ;;  %v375_v44 = vsel %vm367_vm12, 1, %v1789_v43  ;;  %v376_v45 = vsel %vm368_vm13, 1, %v1789_v43 }
 0x1fa   :  { %v353_v34 = vmax.f32 %v351_v32, %v352_v33  ;;  %v377_v46 = vsel %vm369_vm14, 1, %v1789_v43  ;;  %v378_v47 = vsel %vm370_vm15, 1, %v1789_v43  ;;  %v379_v48 = vsel %vm371_vm1, 1, %v1789_v43 }
 0x1fb   :  { %v380_v49 = vsel %vm372_vm2, 1, %v1789_v43  ;;  %v381_v50 = vsel %vm373_vm3, 1, %v1789_v43  ;;  %v382_v51 = vsel %vm374_vm4, 1, %v1789_v43  ;;  %v383_v52 = vcombine.low %v375_v44, %v376_v45 }
 0x1fc   :  { %354 = vmax.xlane.f32.xlu1 %v353_v34  ;;  %v384_v1 = vcombine.low %v377_v46, %v378_v47  ;;  %v400_v2 = vcombine.low %v379_v48, %v380_v49  ;;  %v401_v3 = vcombine.low %v381_v50, %v382_v51 }
 0x1fd   :  { %v391_v4 = vrot.slane %v383_v52, %v1819_v5 }
 0x1fe   :  { %v398_v6 = vrot.slane %v384_v1, %v1819_v5  ;;  %v408_v7 = vrot.slane %v400_v2, %v1819_v5  ;;  %v415_v10 = vrot.slane %v401_v3, %v1819_v5 }
 0x200   :  { %v399_v12 = vcombine.low %v391_v4, %v398_v6  ;;  %v416_v18 = vcombine.low %v408_v7, %v415_v10 }
 0x202   :  { %vm417_vm5 = vcmp.ne.s32.totalorder %v399_v12, 0  ;;  %vm418_vm8 = vcmp.ne.s32.totalorder %v416_v18, 0 }
 0x289   :  { %v355_v19 = vpop.xlane.xlu1 %354 }
 0x28a   :  { %v363_v22 = vrot.slane %v355_v19, %v1910_v54 }
 0x28c   :  { %vm365_vm6 = vcmp.eq.f32.partialorder %v1821_v8, %v363_v22  ;;  %vm366_vm7 = vcmp.eq.f32.partialorder %v1823_v9, %v363_v22 }
 0x28d   :  { %vm419_vm9 = vmand %vm365_vm6, %vm417_vm5 }
 0x28e   :  { %vm420_vm10 = vmand %vm366_vm7, %vm418_vm8  ;;  %v421_v23 = vsel %vm419_vm9, %v1912_v55, 1024 }
 0x28f   :  { %v422_v24 = vsel %vm420_vm10, %v1914_v56, 1024  ;;  %v423_v25 = vcombine.high %v421_v23, %v421_v23  ;;  %v430_v26 = vrot.slane %v421_v23, %v1819_v5 }
 0x290   :  { %v440_v27 = vcombine.high %v422_v24, %v422_v24  ;;  %v447_v28 = vrot.slane %v422_v24, %v1819_v5 }
 0x291   :  { %v437_v29 = vrot.slane %v423_v25, %v1819_v5  ;;  %v438_v30 = vcombine.high %v430_v26, %v430_v26  ;;  %v457_v31 = vsel %vm72_vm0, %v430_v26, 2147483647 }
 0x292   :  { %v454_v32 = vrot.slane %v440_v27, %v1819_v5  ;;  %v455_v33 = vcombine.high %v447_v28, %v447_v28  ;;  %v461_v34 = vsel %vm72_vm0, %v447_v28, 2147483647 }
 0x293   :  { %v439_v44 = vcombine.high %v437_v29, %v437_v29  ;;  %v458_v45 = vsel %vm72_vm0, %v438_v30, 2147483647  ;;  %v459_v46 = vsel %vm72_vm0, %v437_v29, 2147483647  ;;  %vm462_vm11 = vcmp.lt.s32.totalorder %v457_v31, %v461_v34 }
 0x294   :  { %v456_v47 = vcombine.high %v454_v32, %v454_v32  ;;  %v464_v48 = vsel %vm72_vm0, %v455_v33, 2147483647  ;;  %v467_v49 = vsel %vm72_vm0, %v454_v32, 2147483647  ;;  %v463_v51 = vsel %vm462_vm11, %v457_v31, %v461_v34 }
 0x295   :  { %v460_v50 = vsel %vm72_vm0, %v439_v44, 2147483647  ;;  %vm465_vm12 = vcmp.lt.s32.totalorder %v458_v45, %v464_v48  ;;  %vm468_vm13 = vcmp.lt.s32.totalorder %v459_v46, %v467_v49 }
 0x296   :  { %v466_v52 = vsel %vm465_vm12, %v458_v45, %v464_v48  ;;  %v470_v1 = vsel %vm72_vm0, %v456_v47, 2147483647  ;;  %v469_v2 = vsel %vm468_vm13, %v459_v46, %v467_v49 }
 0x297   :  { %vm471_vm14 = vcmp.lt.s32.totalorder %v460_v50, %v470_v1  ;;  %vm473_vm15 = vcmp.lt.s32.totalorder %v463_v51, %v466_v52 }
 0x298   :  { %v472_v3 = vsel %vm471_vm14, %v460_v50, %v470_v1  ;;  %v474_v4 = vsel %vm473_vm15, %v463_v51, %v466_v52 }
 0x299   :  { %vm475_vm1 = vcmp.lt.s32.totalorder %v469_v2, %v472_v3 }
 0x29a   :  { %v476_v6 = vsel %vm475_vm1, %v469_v2, %v472_v3 }
 0x29b   :  { %vm477_vm2 = vcmp.lt.s32.totalorder %v474_v4, %v476_v6 }
 0x29c   :  { %v478_v7 = vsel %vm477_vm2, %v474_v4, %v476_v6 }
 0x29d   :  { %v480_v10 = vshra.s32 %v478_v7, 16  ;;  %v479_v18 = vand.u32 65535, %v478_v7 }
 0x29f   :  { %v482_v12 = vcvt.s32.f32 %v480_v10  ;;  %v481_v22 = vcvt.s32.f32 %v479_v18 }
 0x2a1   :  { %483 = vmin.xlane.f32.xlu0 %v482_v12 }
 0x32e   :  { %v484_v19 = vpop.xlane.xlu0 %483 }
 0x32f   :  { %vm485_vm3 = vcmp.eq.f32.partialorder %v482_v12, %v484_v19  ;;  %v490_v24 = vcvt.f32.s32 %v484_v19 }
 0x330   :  { %v486_v23 = vsel %vm485_vm3, %v481_v22, inf }
 0x331   :  { %487 = vmin.xlane.f32.xlu1 %v486_v23  ;;  %v491_v26 = vshll.u32 %v490_v24, 16 }
 0x3be   :  { %v488_v25 = vpop.xlane.xlu1 %487 }
 0x3bf   :  { %v489_v27 = vcvt.f32.s32 %v488_v25 }
 0x3c1   :  { %v492_v28 = vadd.s32 %v491_v26, %v489_v27 }
 0x3c3   :  { %vm493_vm4 = vcmp.eq.s32.totalorder %v1875_v35, %v492_v28  ;;  %vm494_vm5 = vcmp.eq.s32.totalorder %v1878_v36, %v492_v28  ;;  %vm495_vm6 = vcmp.eq.s32.totalorder %v1881_v37, %v492_v28  ;;  %vm496_vm7 = vcmp.eq.s32.totalorder %v1884_v38, %v492_v28 }
 0x3c4   :  { %vm497_vm8 = vcmp.eq.s32.totalorder %v1887_v39, %v492_v28  ;;  %vm498_vm9 = vcmp.eq.s32.totalorder %v1890_v40, %v492_v28  ;;  %vm499_vm10 = vcmp.eq.s32.totalorder %v1893_v41, %v492_v28  ;;  %vm500_vm11 = vcmp.eq.s32.totalorder %v1896_v42, %v492_v28 }
 0x3c5   :  { %v2031_v29 = vsel %vm493_vm4, 1.0, %v1945_v53  ;;  %v2034_v30 = vsel %vm494_vm5, 1.0, %v1947_v57  ;;  %v2037_v31 = vsel %vm495_vm6, 1.0, %v1949_v59  ;;  %v2040_v32 = vsel %vm496_vm7, 1.0, %v1951_v60 }
 0x3c6   :  { %v2043_v33 = vsel %vm497_vm8, 1.0, %v1953_v61  ;;  %v2046_v34 = vsel %vm498_vm9, 1.0, %v1955_v62  ;;  %v2049_v44 = vsel %vm499_vm10, 1.0, %v1957_v63  ;;  %v2052_v53 = vsel %vm500_vm11, 1.0, %v1959_v0 }
 0x3c7   :  { %vm509_vm12 = vcmp.gt.f32.partialorder %v2031_v29, 0.0  ;;  %vm510_vm13 = vcmp.gt.f32.partialorder %v2034_v30, 0.0  ;;  %vm511_vm14 = vcmp.gt.f32.partialorder %v2037_v31, 0.0  ;;  %vm512_vm15 = vcmp.gt.f32.partialorder %v2040_v32, 0.0 }
 0x3c8   :  { %vm513_vm1 = vcmp.gt.f32.partialorder %v2043_v33, 0.0  ;;  %vm514_vm2 = vcmp.gt.f32.partialorder %v2046_v34, 0.0  ;;  %vm515_vm3 = vcmp.gt.f32.partialorder %v2049_v44, 0.0  ;;  %vm516_vm4 = vcmp.gt.f32.partialorder %v2052_v53, 0.0 }
 0x3c9   :  { %v517_v57 = vsel %vm509_vm12, -inf, %v1829_v11  ;;  %v518_v59 = vsel %vm510_vm13, -inf, %v1842_v15  ;;  %v519_v60 = vsel %vm511_vm14, -inf, %v1838_v14  ;;  %v520_v61 = vsel %vm512_vm15, -inf, %v1857_v20 }
 0x3ca   :  { %v521_v62 = vsel %vm513_vm1, -inf, %v1835_v13  ;;  %v522_v63 = vsel %vm514_vm2, -inf, %v1849_v17  ;;  %v523_v0 = vsel %vm515_vm3, -inf, %v1845_v16  ;;  %v524_v45 = vsel %vm516_vm4, -inf, %v1861_v21 }
 0x3cb   :  { %v525_v46 = vsel %vm72_vm0, %v517_v57, -inf  ;;  %v526_v47 = vsel %vm72_vm0, %v518_v59, -inf  ;;  %v527_v48 = vsel %vm72_vm0, %v519_v60, -inf  ;;  %v528_v49 = vsel %vm72_vm0, %v520_v61, -inf }
 0x3cc   :  { %v529_v50 = vsel %vm72_vm0, %v521_v62, -inf  ;;  %v531_v51 = vsel %vm72_vm0, %v522_v63, -inf  ;;  %v533_v52 = vsel %vm72_vm0, %v523_v0, -inf  ;;  %v535_v1 = vsel %vm72_vm0, %v524_v45, -inf }
 0x3cd   :  { %v530_v2 = vmax.f32 %v525_v46, %v529_v50  ;;  %v532_v3 = vmax.f32 %v526_v47, %v531_v51  ;;  %v534_v4 = vmax.f32 %v527_v48, %v533_v52  ;;  %v536_v6 = vmax.f32 %v528_v49, %v535_v1 }
 0x3ce   :  { %vm553_vm5 = vcmp.eq.f32.partialorder %v2031_v29, 0.0  ;;  %vm554_vm6 = vcmp.eq.f32.partialorder %v2034_v30, 0.0  ;;  %vm555_vm7 = vcmp.eq.f32.partialorder %v2037_v31, 0.0  ;;  %vm556_vm8 = vcmp.eq.f32.partialorder %v2040_v32, 0.0 }
 0x3cf   :  { %v537_v7 = vmax.f32 %v530_v2, %v532_v3  ;;  %v538_v10 = vmax.f32 %v534_v4, %v536_v6  ;;  %vm557_vm9 = vcmp.eq.f32.partialorder %v2043_v33, 0.0  ;;  %vm558_vm10 = vcmp.eq.f32.partialorder %v2046_v34, 0.0 }
 0x3d0   :  { %vm559_vm11 = vcmp.eq.f32.partialorder %v2049_v44, 0.0  ;;  %vm560_vm12 = vcmp.eq.f32.partialorder %v2052_v53, 0.0  ;;  %v561_v18 = vsel %vm553_vm5, 1, %v1789_v43  ;;  %v562_v19 = vsel %vm554_vm6, 1, %v1789_v43 }
 0x3d1   :  { %v539_v12 = vmax.f32 %v537_v7, %v538_v10  ;;  %v563_v22 = vsel %vm555_vm7, 1, %v1789_v43  ;;  %v564_v23 = vsel %vm556_vm8, 1, %v1789_v43  ;;  %v565_v24 = vsel %vm557_vm9, 1, %v1789_v43 }
 0x3d2   :  { %v566_v25 = vsel %vm558_vm10, 1, %v1789_v43  ;;  %v567_v26 = vsel %vm559_vm11, 1, %v1789_v43  ;;  %v568_v27 = vsel %vm560_vm12, 1, %v1789_v43  ;;  %v569_v28 = vcombine.low %v561_v18, %v562_v19 }
 0x3d3   :  { %540 = vmax.xlane.f32.xlu0 %v539_v12  ;;  %v570_v57 = vcombine.low %v563_v22, %v564_v23  ;;  %v586_v59 = vcombine.low %v565_v24, %v566_v25  ;;  %v587_v60 = vcombine.low %v567_v26, %v568_v27 }
 0x3d4   :  { %v577_v61 = vrot.slane %v569_v28, %v1819_v5 }
 0x3d5   :  { %v584_v62 = vrot.slane %v570_v57, %v1819_v5  ;;  %v594_v63 = vrot.slane %v586_v59, %v1819_v5  ;;  %v601_v0 = vrot.slane %v587_v60, %v1819_v5 }
 0x3d7   :  { %v585_v45 = vcombine.low %v577_v61, %v584_v62  ;;  %v602_v46 = vcombine.low %v594_v63, %v601_v0 }
 0x3d9   :  { %vm603_vm13 = vcmp.ne.s32.totalorder %v585_v45, 0  ;;  %vm604_vm1 = vcmp.ne.s32.totalorder %v602_v46, 0 }
 0x460   :  { %v541_v47 = vpop.xlane.xlu0 %540 }
 0x461   :  { %v549_v48 = vrot.slane %v541_v47, %v1910_v54 }
 0x463   :  { %vm551_vm14 = vcmp.eq.f32.partialorder %v1821_v8, %v549_v48  ;;  %vm552_vm15 = vcmp.eq.f32.partialorder %v1823_v9, %v549_v48 }
 0x464   :  { %vm605_vm2 = vmand %vm551_vm14, %vm603_vm13 }
 0x465   :  { %vm606_vm3 = vmand %vm552_vm15, %vm604_vm1  ;;  %v607_v49 = vsel %vm605_vm2, %v1912_v55, 1024 }
 0x466   :  { %v608_v50 = vsel %vm606_vm3, %v1914_v56, 1024  ;;  %v609_v51 = vcombine.high %v607_v49, %v607_v49  ;;  %v616_v52 = vrot.slane %v607_v49, %v1819_v5 }
 0x467   :  { %v626_v1 = vcombine.high %v608_v50, %v608_v50  ;;  %v633_v2 = vrot.slane %v608_v50, %v1819_v5 }
 0x468   :  { %v623_v3 = vrot.slane %v609_v51, %v1819_v5  ;;  %v624_v4 = vcombine.high %v616_v52, %v616_v52  ;;  %v643_v6 = vsel %vm72_vm0, %v616_v52, 2147483647 }
 0x469   :  { %v640_v7 = vrot.slane %v626_v1, %v1819_v5  ;;  %v641_v10 = vcombine.high %v633_v2, %v633_v2  ;;  %v647_v12 = vsel %vm72_vm0, %v633_v2, 2147483647 }
 0x46a   :  { %v625_v18 = vcombine.high %v623_v3, %v623_v3  ;;  %v644_v19 = vsel %vm72_vm0, %v624_v4, 2147483647  ;;  %v645_v22 = vsel %vm72_vm0, %v623_v3, 2147483647  ;;  %vm648_vm4 = vcmp.lt.s32.totalorder %v643_v6, %v647_v12 }
 0x46b   :  { %v642_v23 = vcombine.high %v640_v7, %v640_v7  ;;  %v650_v24 = vsel %vm72_vm0, %v641_v10, 2147483647  ;;  %v653_v25 = vsel %vm72_vm0, %v640_v7, 2147483647  ;;  %v649_v27 = vsel %vm648_vm4, %v643_v6, %v647_v12 }
 0x46c   :  { %v646_v26 = vsel %vm72_vm0, %v625_v18, 2147483647  ;;  %vm651_vm5 = vcmp.lt.s32.totalorder %v644_v19, %v650_v24  ;;  %vm654_vm6 = vcmp.lt.s32.totalorder %v645_v22, %v653_v25 }
 0x46d   :  { %v652_v28 = vsel %vm651_vm5, %v644_v19, %v650_v24  ;;  %v656_v57 = vsel %vm72_vm0, %v642_v23, 2147483647  ;;  %v655_v59 = vsel %vm654_vm6, %v645_v22, %v653_v25 }
 0x46e   :  { %vm657_vm7 = vcmp.lt.s32.totalorder %v646_v26, %v656_v57  ;;  %vm659_vm8 = vcmp.lt.s32.totalorder %v649_v27, %v652_v28 }
 0x46f   :  { %v658_v60 = vsel %vm657_vm7, %v646_v26, %v656_v57  ;;  %v660_v61 = vsel %vm659_vm8, %v649_v27, %v652_v28 }
 0x470   :  { %vm661_vm9 = vcmp.lt.s32.totalorder %v655_v59, %v658_v60 }
 0x471   :  { %v662_v62 = vsel %vm661_vm9, %v655_v59, %v658_v60 }
 0x472   :  { %vm663_vm10 = vcmp.lt.s32.totalorder %v660_v61, %v662_v62 }
 0x473   :  { %v664_v63 = vsel %vm663_vm10, %v660_v61, %v662_v62 }
 0x474   :  { %v666_v0 = vshra.s32 %v664_v63, 16  ;;  %v665_v46 = vand.u32 65535, %v664_v63 }
 0x476   :  { %v668_v45 = vcvt.s32.f32 %v666_v0  ;;  %v667_v48 = vcvt.s32.f32 %v665_v46 }
 0x478   :  { %669 = vmin.xlane.f32.xlu1 %v668_v45 }
 0x505   :  { %v670_v47 = vpop.xlane.xlu1 %669 }
 0x506   :  { %vm671_vm11 = vcmp.eq.f32.partialorder %v668_v45, %v670_v47  ;;  %v676_v50 = vcvt.f32.s32 %v670_v47 }
 0x507   :  { %v672_v49 = vsel %vm671_vm11, %v667_v48, inf }
 0x508   :  { %673 = vmin.xlane.f32.xlu0 %v672_v49  ;;  %v677_v52 = vshll.u32 %v676_v50, 16 }
 0x595   :  { %v674_v51 = vpop.xlane.xlu0 %673 }
 0x596   :  { %v675_v1 = vcvt.f32.s32 %v674_v51 }
 0x598   :  { %v678_v2 = vadd.s32 %v677_v52, %v675_v1 }
 0x59a   :  { %vm679_vm12 = vcmp.eq.s32.totalorder %v1875_v35, %v678_v2  ;;  %vm680_vm13 = vcmp.eq.s32.totalorder %v1878_v36, %v678_v2  ;;  %vm681_vm14 = vcmp.eq.s32.totalorder %v1881_v37, %v678_v2  ;;  %vm682_vm15 = vcmp.eq.s32.totalorder %v1884_v38, %v678_v2 }
 0x59b   :  { %vm683_vm1 = vcmp.eq.s32.totalorder %v1887_v39, %v678_v2  ;;  %vm684_vm2 = vcmp.eq.s32.totalorder %v1890_v40, %v678_v2  ;;  %vm685_vm3 = vcmp.eq.s32.totalorder %v1893_v41, %v678_v2  ;;  %vm686_vm4 = vcmp.eq.s32.totalorder %v1896_v42, %v678_v2 }
 0x59c   :  { %v2124_v3 = vsel %vm679_vm12, 1.0, %v2031_v29  ;;  %v2127_v4 = vsel %vm680_vm13, 1.0, %v2034_v30  ;;  %v2130_v6 = vsel %vm681_vm14, 1.0, %v2037_v31  ;;  %v2133_v7 = vsel %vm682_vm15, 1.0, %v2040_v32 }
 0x59d   :  { %v2136_v10 = vsel %vm683_vm1, 1.0, %v2043_v33  ;;  %v2139_v12 = vsel %vm684_vm2, 1.0, %v2046_v34  ;;  %v2142_v18 = vsel %vm685_vm3, 1.0, %v2049_v44  ;;  %v2145_v29 = vsel %vm686_vm4, 1.0, %v2052_v53 }
 0x59e   :  { %vm695_vm5 = vcmp.gt.f32.partialorder %v2124_v3, 0.0  ;;  %vm696_vm6 = vcmp.gt.f32.partialorder %v2127_v4, 0.0  ;;  %vm697_vm7 = vcmp.gt.f32.partialorder %v2130_v6, 0.0  ;;  %vm698_vm8 = vcmp.gt.f32.partialorder %v2133_v7, 0.0 }
 0x59f   :  { %vm699_vm9 = vcmp.gt.f32.partialorder %v2136_v10, 0.0  ;;  %vm700_vm10 = vcmp.gt.f32.partialorder %v2139_v12, 0.0  ;;  %vm701_vm11 = vcmp.gt.f32.partialorder %v2142_v18, 0.0  ;;  %vm702_vm12 = vcmp.gt.f32.partialorder %v2145_v29, 0.0 }
 0x5a0   :  { %v703_v30 = vsel %vm695_vm5, -inf, %v1829_v11  ;;  %v704_v31 = vsel %vm696_vm6, -inf, %v1842_v15  ;;  %v705_v32 = vsel %vm697_vm7, -inf, %v1838_v14  ;;  %v706_v33 = vsel %vm698_vm8, -inf, %v1857_v20 }
 0x5a1   :  { %v707_v34 = vsel %vm699_vm9, -inf, %v1835_v13  ;;  %v708_v44 = vsel %vm700_vm10, -inf, %v1849_v17  ;;  %v709_v53 = vsel %vm701_vm11, -inf, %v1845_v16  ;;  %v710_v19 = vsel %vm702_vm12, -inf, %v1861_v21 }
 0x5a2   :  { %v711_v22 = vsel %vm72_vm0, %v703_v30, -inf  ;;  %v712_v23 = vsel %vm72_vm0, %v704_v31, -inf  ;;  %v713_v24 = vsel %vm72_vm0, %v705_v32, -inf  ;;  %v714_v25 = vsel %vm72_vm0, %v706_v33, -inf }
 0x5a3   :  { %v715_v26 = vsel %vm72_vm0, %v707_v34, -inf  ;;  %v717_v27 = vsel %vm72_vm0, %v708_v44, -inf  ;;  %v719_v28 = vsel %vm72_vm0, %v709_v53, -inf  ;;  %v721_v57 = vsel %vm72_vm0, %v710_v19, -inf }
 0x5a4   :  { %v716_v59 = vmax.f32 %v711_v22, %v715_v26  ;;  %v718_v60 = vmax.f32 %v712_v23, %v717_v27  ;;  %v720_v61 = vmax.f32 %v713_v24, %v719_v28  ;;  %v722_v62 = vmax.f32 %v714_v25, %v721_v57 }
 0x5a5   :  { %vm739_vm13 = vcmp.eq.f32.partialorder %v2124_v3, 0.0  ;;  %vm740_vm14 = vcmp.eq.f32.partialorder %v2127_v4, 0.0  ;;  %vm741_vm15 = vcmp.eq.f32.partialorder %v2130_v6, 0.0  ;;  %vm742_vm1 = vcmp.eq.f32.partialorder %v2133_v7, 0.0 }
 0x5a6   :  { %v723_v63 = vmax.f32 %v716_v59, %v718_v60  ;;  %v724_v0 = vmax.f32 %v720_v61, %v722_v62  ;;  %vm743_vm2 = vcmp.eq.f32.partialorder %v2136_v10, 0.0  ;;  %vm744_vm3 = vcmp.eq.f32.partialorder %v2139_v12, 0.0 }
 0x5a7   :  { %vm745_vm4 = vcmp.eq.f32.partialorder %v2142_v18, 0.0  ;;  %vm746_vm5 = vcmp.eq.f32.partialorder %v2145_v29, 0.0  ;;  %v747_v46 = vsel %vm739_vm13, 1, %v1789_v43  ;;  %v748_v47 = vsel %vm740_vm14, 1, %v1789_v43 }
 0x5a8   :  { %v725_v45 = vmax.f32 %v723_v63, %v724_v0  ;;  %v749_v48 = vsel %vm741_vm15, 1, %v1789_v43  ;;  %v750_v49 = vsel %vm742_vm1, 1, %v1789_v43  ;;  %v751_v50 = vsel %vm743_vm2, 1, %v1789_v43 }
 0x5a9   :  { %v752_v51 = vsel %vm744_vm3, 1, %v1789_v43  ;;  %v753_v52 = vsel %vm745_vm4, 1, %v1789_v43  ;;  %v754_v1 = vsel %vm746_vm5, 1, %v1789_v43  ;;  %v755_v2 = vcombine.low %v747_v46, %v748_v47 }
 0x5aa   :  { %726 = vmax.xlane.f32.xlu1 %v725_v45  ;;  %v756_v30 = vcombine.low %v749_v48, %v750_v49  ;;  %v772_v31 = vcombine.low %v751_v50, %v752_v51  ;;  %v773_v32 = vcombine.low %v753_v52, %v754_v1 }
 0x5ab   :  { %v763_v33 = vrot.slane %v755_v2, %v1819_v5 }
 0x5ac   :  { %v770_v34 = vrot.slane %v756_v30, %v1819_v5  ;;  %v780_v44 = vrot.slane %v772_v31, %v1819_v5  ;;  %v787_v53 = vrot.slane %v773_v32, %v1819_v5 }
 0x5ae   :  { %v771_v19 = vcombine.low %v763_v33, %v770_v34  ;;  %v788_v22 = vcombine.low %v780_v44, %v787_v53 }
 0x5b0   :  { %vm789_vm6 = vcmp.ne.s32.totalorder %v771_v19, 0  ;;  %vm790_vm9 = vcmp.ne.s32.totalorder %v788_v22, 0 }
 0x637   :  { %v727_v23 = vpop.xlane.xlu1 %726 }
 0x638   :  { %v735_v24 = vrot.slane %v727_v23, %v1910_v54 }
 0x63a   :  { %vm737_vm7 = vcmp.eq.f32.partialorder %v1821_v8, %v735_v24  ;;  %vm738_vm8 = vcmp.eq.f32.partialorder %v1823_v9, %v735_v24 }
 0x63b   :  { %vm791_vm10 = vmand %vm737_vm7, %vm789_vm6 }
 0x63c   :  { %vm792_vm11 = vmand %vm738_vm8, %vm790_vm9  ;;  %v793_v25 = vsel %vm791_vm10, %v1912_v55, 1024 }
 0x63d   :  { %v794_v26 = vsel %vm792_vm11, %v1914_v56, 1024  ;;  %v795_v27 = vcombine.high %v793_v25, %v793_v25  ;;  %v802_v28 = vrot.slane %v793_v25, %v1819_v5 }
 0x63e   :  { %v812_v57 = vcombine.high %v794_v26, %v794_v26  ;;  %v819_v59 = vrot.slane %v794_v26, %v1819_v5 }
 0x63f   :  { %v809_v60 = vrot.slane %v795_v27, %v1819_v5  ;;  %v810_v61 = vcombine.high %v802_v28, %v802_v28  ;;  %v829_v62 = vsel %vm72_vm0, %v802_v28, 2147483647 }
 0x640   :  { %v826_v63 = vrot.slane %v812_v57, %v1819_v5  ;;  %v827_v0 = vcombine.high %v819_v59, %v819_v59  ;;  %v833_v45 = vsel %vm72_vm0, %v819_v59, 2147483647 }
 0x641   :  { %v811_v46 = vcombine.high %v809_v60, %v809_v60  ;;  %v830_v47 = vsel %vm72_vm0, %v810_v61, 2147483647  ;;  %v831_v48 = vsel %vm72_vm0, %v809_v60, 2147483647  ;;  %vm834_vm12 = vcmp.lt.s32.totalorder %v829_v62, %v833_v45 }
 0x642   :  { %v828_v49 = vcombine.high %v826_v63, %v826_v63  ;;  %v836_v50 = vsel %vm72_vm0, %v827_v0, 2147483647  ;;  %v839_v51 = vsel %vm72_vm0, %v826_v63, 2147483647  ;;  %v835_v1 = vsel %vm834_vm12, %v829_v62, %v833_v45 }
 0x643   :  { %v832_v52 = vsel %vm72_vm0, %v811_v46, 2147483647  ;;  %vm837_vm13 = vcmp.lt.s32.totalorder %v830_v47, %v836_v50  ;;  %vm840_vm14 = vcmp.lt.s32.totalorder %v831_v48, %v839_v51 }
 0x644   :  { %v838_v2 = vsel %vm837_vm13, %v830_v47, %v836_v50  ;;  %v842_v30 = vsel %vm72_vm0, %v828_v49, 2147483647  ;;  %v841_v31 = vsel %vm840_vm14, %v831_v48, %v839_v51 }
 0x645   :  { %vm843_vm15 = vcmp.lt.s32.totalorder %v832_v52, %v842_v30  ;;  %vm845_vm1 = vcmp.lt.s32.totalorder %v835_v1, %v838_v2 }
 0x646   :  { %v844_v32 = vsel %vm843_vm15, %v832_v52, %v842_v30  ;;  %v846_v33 = vsel %vm845_vm1, %v835_v1, %v838_v2 }
 0x647   :  { %vm847_vm2 = vcmp.lt.s32.totalorder %v841_v31, %v844_v32 }
 0x648   :  { %v848_v34 = vsel %vm847_vm2, %v841_v31, %v844_v32 }
 0x649   :  { %vm849_vm3 = vcmp.lt.s32.totalorder %v846_v33, %v848_v34 }
 0x64a   :  { %v850_v44 = vsel %vm849_vm3, %v846_v33, %v848_v34 }
 0x64b   :  { %v852_v53 = vshra.s32 %v850_v44, 16  ;;  %v851_v22 = vand.u32 65535, %v850_v44 }
 0x64d   :  { %v854_v19 = vcvt.s32.f32 %v852_v53  ;;  %v853_v24 = vcvt.s32.f32 %v851_v22 }
 0x64f   :  { %855 = vmin.xlane.f32.xlu0 %v854_v19 }
 0x6dc   :  { %v856_v23 = vpop.xlane.xlu0 %855 }
 0x6dd   :  { %vm857_vm4 = vcmp.eq.f32.partialorder %v854_v19, %v856_v23  ;;  %v862_v26 = vcvt.f32.s32 %v856_v23 }
 0x6de   :  { %v858_v25 = vsel %vm857_vm4, %v853_v24, inf }
 0x6df   :  { %859 = vmin.xlane.f32.xlu1 %v858_v25  ;;  %v863_v28 = vshll.u32 %v862_v26, 16 }
 0x76c   :  { %v860_v27 = vpop.xlane.xlu1 %859 }
 0x76d   :  { %v861_v57 = vcvt.f32.s32 %v860_v27 }
 0x76f   :  { %v864_v59 = vadd.s32 %v863_v28, %v861_v57 }
 0x771   :  { %vm865_vm5 = vcmp.eq.s32.totalorder %v1875_v35, %v864_v59  ;;  %vm866_vm6 = vcmp.eq.s32.totalorder %v1878_v36, %v864_v59  ;;  %vm867_vm7 = vcmp.eq.s32.totalorder %v1881_v37, %v864_v59  ;;  %vm868_vm8 = vcmp.eq.s32.totalorder %v1884_v38, %v864_v59 }
 0x772   :  { %vm869_vm9 = vcmp.eq.s32.totalorder %v1887_v39, %v864_v59  ;;  %vm870_vm10 = vcmp.eq.s32.totalorder %v1890_v40, %v864_v59  ;;  %vm871_vm11 = vcmp.eq.s32.totalorder %v1893_v41, %v864_v59  ;;  %vm872_vm12 = vcmp.eq.s32.totalorder %v1896_v42, %v864_v59 }
 0x773   :  { %v2217_v60 = vsel %vm865_vm5, 1.0, %v2124_v3  ;;  %v2220_v61 = vsel %vm866_vm6, 1.0, %v2127_v4  ;;  %v2223_v62 = vsel %vm867_vm7, 1.0, %v2130_v6  ;;  %v2226_v63 = vsel %vm868_vm8, 1.0, %v2133_v7 }
 0x774   :  { %v2229_v0 = vsel %vm869_vm9, 1.0, %v2136_v10  ;;  %v2232_v45 = vsel %vm870_vm10, 1.0, %v2139_v12  ;;  %v2235_v46 = vsel %vm871_vm11, 1.0, %v2142_v18  ;;  %v2238_v3 = vsel %vm872_vm12, 1.0, %v2145_v29 }
 0x775   :  { %vm881_vm13 = vcmp.gt.f32.partialorder %v2217_v60, 0.0  ;;  %vm882_vm14 = vcmp.gt.f32.partialorder %v2220_v61, 0.0  ;;  %vm883_vm15 = vcmp.gt.f32.partialorder %v2223_v62, 0.0  ;;  %vm884_vm1 = vcmp.gt.f32.partialorder %v2226_v63, 0.0 }
 0x776   :  { %vm885_vm2 = vcmp.gt.f32.partialorder %v2229_v0, 0.0  ;;  %vm886_vm3 = vcmp.gt.f32.partialorder %v2232_v45, 0.0  ;;  %vm887_vm4 = vcmp.gt.f32.partialorder %v2235_v46, 0.0  ;;  %vm888_vm5 = vcmp.gt.f32.partialorder %v2238_v3, 0.0 }
 0x777   :  { %v889_v4 = vsel %vm881_vm13, -inf, %v1829_v11  ;;  %v890_v6 = vsel %vm882_vm14, -inf, %v1842_v15  ;;  %v891_v7 = vsel %vm883_vm15, -inf, %v1838_v14  ;;  %v892_v10 = vsel %vm884_vm1, -inf, %v1857_v20 }
 0x778   :  { %v893_v12 = vsel %vm885_vm2, -inf, %v1835_v13  ;;  %v894_v18 = vsel %vm886_vm3, -inf, %v1849_v17  ;;  %v895_v29 = vsel %vm887_vm4, -inf, %v1845_v16  ;;  %v896_v47 = vsel %vm888_vm5, -inf, %v1861_v21 }
 0x779   :  { %v897_v48 = vsel %vm72_vm0, %v889_v4, -inf  ;;  %v898_v49 = vsel %vm72_vm0, %v890_v6, -inf  ;;  %v899_v50 = vsel %vm72_vm0, %v891_v7, -inf  ;;  %v900_v51 = vsel %vm72_vm0, %v892_v10, -inf }
 0x77a   :  { %v901_v52 = vsel %vm72_vm0, %v893_v12, -inf  ;;  %v903_v1 = vsel %vm72_vm0, %v894_v18, -inf  ;;  %v905_v2 = vsel %vm72_vm0, %v895_v29, -inf  ;;  %v907_v30 = vsel %vm72_vm0, %v896_v47, -inf }
 0x77b   :  { %v902_v31 = vmax.f32 %v897_v48, %v901_v52  ;;  %v904_v32 = vmax.f32 %v898_v49, %v903_v1  ;;  %v906_v33 = vmax.f32 %v899_v50, %v905_v2  ;;  %v908_v34 = vmax.f32 %v900_v51, %v907_v30 }
 0x77c   :  { %vm925_vm6 = vcmp.eq.f32.partialorder %v2217_v60, 0.0  ;;  %vm926_vm7 = vcmp.eq.f32.partialorder %v2220_v61, 0.0  ;;  %vm927_vm8 = vcmp.eq.f32.partialorder %v2223_v62, 0.0  ;;  %vm928_vm9 = vcmp.eq.f32.partialorder %v2226_v63, 0.0 }
 0x77d   :  { %v909_v44 = vmax.f32 %v902_v31, %v904_v32  ;;  %v910_v53 = vmax.f32 %v906_v33, %v908_v34  ;;  %vm929_vm10 = vcmp.eq.f32.partialorder %v2229_v0, 0.0  ;;  %vm930_vm11 = vcmp.eq.f32.partialorder %v2232_v45, 0.0 }
 0x77e   :  { %vm931_vm12 = vcmp.eq.f32.partialorder %v2235_v46, 0.0  ;;  %vm932_vm13 = vcmp.eq.f32.partialorder %v2238_v3, 0.0  ;;  %v933_v22 = vsel %vm925_vm6, 1, %v1789_v43  ;;  %v934_v23 = vsel %vm926_vm7, 1, %v1789_v43 }
 0x77f   :  { %v911_v19 = vmax.f32 %v909_v44, %v910_v53  ;;  %v935_v24 = vsel %vm927_vm8, 1, %v1789_v43  ;;  %v936_v25 = vsel %vm928_vm9, 1, %v1789_v43  ;;  %v937_v26 = vsel %vm929_vm10, 1, %v1789_v43 }
 0x780   :  { %v938_v27 = vsel %vm930_vm11, 1, %v1789_v43  ;;  %v939_v28 = vsel %vm931_vm12, 1, %v1789_v43  ;;  %v940_v57 = vsel %vm932_vm13, 1, %v1789_v43  ;;  %v941_v59 = vcombine.low %v933_v22, %v934_v23 }
 0x781   :  { %912 = vmax.xlane.f32.xlu0 %v911_v19  ;;  %v942_v4 = vcombine.low %v935_v24, %v936_v25  ;;  %v958_v6 = vcombine.low %v937_v26, %v938_v27  ;;  %v959_v7 = vcombine.low %v939_v28, %v940_v57 }
 0x782   :  { %v949_v10 = vrot.slane %v941_v59, %v1819_v5 }
 0x783   :  { %v956_v12 = vrot.slane %v942_v4, %v1819_v5  ;;  %v966_v18 = vrot.slane %v958_v6, %v1819_v5  ;;  %v973_v29 = vrot.slane %v959_v7, %v1819_v5 }
 0x785   :  { %v957_v47 = vcombine.low %v949_v10, %v956_v12  ;;  %v974_v48 = vcombine.low %v966_v18, %v973_v29 }
 0x787   :  { %vm975_vm14 = vcmp.ne.s32.totalorder %v957_v47, 0  ;;  %vm976_vm2 = vcmp.ne.s32.totalorder %v974_v48, 0 }
 0x80e   :  { %v913_v49 = vpop.xlane.xlu0 %912 }
 0x80f   :  { %v921_v50 = vrot.slane %v913_v49, %v1910_v54 }
 0x811   :  { %vm923_vm15 = vcmp.eq.f32.partialorder %v1821_v8, %v921_v50  ;;  %vm924_vm1 = vcmp.eq.f32.partialorder %v1823_v9, %v921_v50 }
 0x812   :  { %vm977_vm3 = vmand %vm923_vm15, %vm975_vm14 }
 0x813   :  { %vm978_vm4 = vmand %vm924_vm1, %vm976_vm2  ;;  %v979_v51 = vsel %vm977_vm3, %v1912_v55, 1024 }
 0x814   :  { %v980_v52 = vsel %vm978_vm4, %v1914_v56, 1024  ;;  %v981_v1 = vcombine.high %v979_v51, %v979_v51  ;;  %v988_v2 = vrot.slane %v979_v51, %v1819_v5 }
 0x815   :  { %v998_v30 = vcombine.high %v980_v52, %v980_v52  ;;  %v1005_v31 = vrot.slane %v980_v52, %v1819_v5 }
 0x816   :  { %v995_v32 = vrot.slane %v981_v1, %v1819_v5  ;;  %v996_v33 = vcombine.high %v988_v2, %v988_v2  ;;  %v1015_v34 = vsel %vm72_vm0, %v988_v2, 2147483647 }
 0x817   :  { %v1012_v44 = vrot.slane %v998_v30, %v1819_v5  ;;  %v1013_v53 = vcombine.high %v1005_v31, %v1005_v31  ;;  %v1019_v19 = vsel %vm72_vm0, %v1005_v31, 2147483647 }
 0x818   :  { %v997_v22 = vcombine.high %v995_v32, %v995_v32  ;;  %v1016_v23 = vsel %vm72_vm0, %v996_v33, 2147483647  ;;  %v1017_v24 = vsel %vm72_vm0, %v995_v32, 2147483647  ;;  %vm1020_vm5 = vcmp.lt.s32.totalorder %v1015_v34, %v1019_v19 }
 0x819   :  { %v1014_v25 = vcombine.high %v1012_v44, %v1012_v44  ;;  %v1022_v26 = vsel %vm72_vm0, %v1013_v53, 2147483647  ;;  %v1025_v27 = vsel %vm72_vm0, %v1012_v44, 2147483647  ;;  %v1021_v57 = vsel %vm1020_vm5, %v1015_v34, %v1019_v19 }
 0x81a   :  { %v1018_v28 = vsel %vm72_vm0, %v997_v22, 2147483647  ;;  %vm1023_vm6 = vcmp.lt.s32.totalorder %v1016_v23, %v1022_v26  ;;  %vm1026_vm7 = vcmp.lt.s32.totalorder %v1017_v24, %v1025_v27 }
 0x81b   :  { %v1024_v59 = vsel %vm1023_vm6, %v1016_v23, %v1022_v26  ;;  %v1028_v4 = vsel %vm72_vm0, %v1014_v25, 2147483647  ;;  %v1027_v6 = vsel %vm1026_vm7, %v1017_v24, %v1025_v27 }
 0x81c   :  { %vm1029_vm8 = vcmp.lt.s32.totalorder %v1018_v28, %v1028_v4  ;;  %vm1031_vm9 = vcmp.lt.s32.totalorder %v1021_v57, %v1024_v59 }
 0x81d   :  { %v1030_v7 = vsel %vm1029_vm8, %v1018_v28, %v1028_v4  ;;  %v1032_v10 = vsel %vm1031_vm9, %v1021_v57, %v1024_v59 }
 0x81e   :  { %vm1033_vm10 = vcmp.lt.s32.totalorder %v1027_v6, %v1030_v7 }
 0x81f   :  { %v1034_v12 = vsel %vm1033_vm10, %v1027_v6, %v1030_v7 }
 0x820   :  { %vm1035_vm11 = vcmp.lt.s32.totalorder %v1032_v10, %v1034_v12 }
 0x821   :  { %v1036_v18 = vsel %vm1035_vm11, %v1032_v10, %v1034_v12 }
 0x822   :  { %v1038_v29 = vshra.s32 %v1036_v18, 16  ;;  %v1037_v48 = vand.u32 65535, %v1036_v18 }
 0x824   :  { %v1040_v47 = vcvt.s32.f32 %v1038_v29  ;;  %v1039_v50 = vcvt.s32.f32 %v1037_v48 }
 0x826   :  { %1041 = vmin.xlane.f32.xlu1 %v1040_v47 }
 0x8b3   :  { %v1042_v49 = vpop.xlane.xlu1 %1041 }
 0x8b4   :  { %vm1043_vm12 = vcmp.eq.f32.partialorder %v1040_v47, %v1042_v49  ;;  %v1048_v52 = vcvt.f32.s32 %v1042_v49 }
 0x8b5   :  { %v1044_v51 = vsel %vm1043_vm12, %v1039_v50, inf }
 0x8b6   :  { %1045 = vmin.xlane.f32.xlu0 %v1044_v51  ;;  %v1049_v2 = vshll.u32 %v1048_v52, 16 }
 0x943   :  { %v1046_v1 = vpop.xlane.xlu0 %1045 }
 0x944   :  { %v1047_v30 = vcvt.f32.s32 %v1046_v1 }
 0x946   :  { %v1050_v31 = vadd.s32 %v1049_v2, %v1047_v30 }
 0x948   :  { %vm1051_vm13 = vcmp.eq.s32.totalorder %v1875_v35, %v1050_v31  ;;  %vm1052_vm14 = vcmp.eq.s32.totalorder %v1878_v36, %v1050_v31  ;;  %vm1053_vm15 = vcmp.eq.s32.totalorder %v1881_v37, %v1050_v31  ;;  %vm1054_vm1 = vcmp.eq.s32.totalorder %v1884_v38, %v1050_v31 }
 0x949   :  { %vm1055_vm2 = vcmp.eq.s32.totalorder %v1887_v39, %v1050_v31  ;;  %vm1056_vm3 = vcmp.eq.s32.totalorder %v1890_v40, %v1050_v31  ;;  %vm1057_vm4 = vcmp.eq.s32.totalorder %v1893_v41, %v1050_v31  ;;  %vm1058_vm5 = vcmp.eq.s32.totalorder %v1896_v42, %v1050_v31 }
 0x94a   :  { %v2310_v32 = vsel %vm1051_vm13, 1.0, %v2217_v60  ;;  %v2313_v33 = vsel %vm1052_vm14, 1.0, %v2220_v61  ;;  %v2316_v34 = vsel %vm1053_vm15, 1.0, %v2223_v62  ;;  %v2319_v44 = vsel %vm1054_vm1, 1.0, %v2226_v63 }
 0x94b   :  { %v2322_v53 = vsel %vm1055_vm2, 1.0, %v2229_v0  ;;  %v2325_v19 = vsel %vm1056_vm3, 1.0, %v2232_v45  ;;  %v2328_v22 = vsel %vm1057_vm4, 1.0, %v2235_v46  ;;  %v2331_v60 = vsel %vm1058_vm5, 1.0, %v2238_v3 }
 0x94c   :  { %vm1067_vm6 = vcmp.gt.f32.partialorder %v2310_v32, 0.0  ;;  %vm1068_vm7 = vcmp.gt.f32.partialorder %v2313_v33, 0.0  ;;  %vm1069_vm8 = vcmp.gt.f32.partialorder %v2316_v34, 0.0  ;;  %vm1070_vm9 = vcmp.gt.f32.partialorder %v2319_v44, 0.0 }
 0x94d   :  { %vm1071_vm10 = vcmp.gt.f32.partialorder %v2322_v53, 0.0  ;;  %vm1072_vm11 = vcmp.gt.f32.partialorder %v2325_v19, 0.0  ;;  %vm1073_vm12 = vcmp.gt.f32.partialorder %v2328_v22, 0.0  ;;  %vm1074_vm13 = vcmp.gt.f32.partialorder %v2331_v60, 0.0 }
 0x94e   :  { %v1075_v61 = vsel %vm1067_vm6, -inf, %v1829_v11  ;;  %v1076_v62 = vsel %vm1068_vm7, -inf, %v1842_v15  ;;  %v1077_v63 = vsel %vm1069_vm8, -inf, %v1838_v14  ;;  %v1078_v0 = vsel %vm1070_vm9, -inf, %v1857_v20 }
 0x94f   :  { %v1079_v45 = vsel %vm1071_vm10, -inf, %v1835_v13  ;;  %v1080_v46 = vsel %vm1072_vm11, -inf, %v1849_v17  ;;  %v1081_v3 = vsel %vm1073_vm12, -inf, %v1845_v16  ;;  %v1082_v23 = vsel %vm1074_vm13, -inf, %v1861_v21 }
 0x950   :  { %v1083_v24 = vsel %vm72_vm0, %v1075_v61, -inf  ;;  %v1084_v25 = vsel %vm72_vm0, %v1076_v62, -inf  ;;  %v1085_v26 = vsel %vm72_vm0, %v1077_v63, -inf  ;;  %v1086_v27 = vsel %vm72_vm0, %v1078_v0, -inf }
 0x951   :  { %v1087_v28 = vsel %vm72_vm0, %v1079_v45, -inf  ;;  %v1089_v57 = vsel %vm72_vm0, %v1080_v46, -inf  ;;  %v1091_v59 = vsel %vm72_vm0, %v1081_v3, -inf  ;;  %v1093_v4 = vsel %vm72_vm0, %v1082_v23, -inf }
 0x952   :  { %v1088_v6 = vmax.f32 %v1083_v24, %v1087_v28  ;;  %v1090_v7 = vmax.f32 %v1084_v25, %v1089_v57  ;;  %v1092_v10 = vmax.f32 %v1085_v26, %v1091_v59  ;;  %v1094_v12 = vmax.f32 %v1086_v27, %v1093_v4 }
 0x953   :  { %vm1111_vm14 = vcmp.eq.f32.partialorder %v2310_v32, 0.0  ;;  %vm1112_vm15 = vcmp.eq.f32.partialorder %v2313_v33, 0.0  ;;  %vm1113_vm1 = vcmp.eq.f32.partialorder %v2316_v34, 0.0  ;;  %vm1114_vm2 = vcmp.eq.f32.partialorder %v2319_v44, 0.0 }
 0x954   :  { %v1095_v18 = vmax.f32 %v1088_v6, %v1090_v7  ;;  %v1096_v29 = vmax.f32 %v1092_v10, %v1094_v12  ;;  %vm1115_vm3 = vcmp.eq.f32.partialorder %v2322_v53, 0.0  ;;  %vm1116_vm4 = vcmp.eq.f32.partialorder %v2325_v19, 0.0 }
 0x955   :  { %vm1117_vm5 = vcmp.eq.f32.partialorder %v2328_v22, 0.0  ;;  %vm1118_vm6 = vcmp.eq.f32.partialorder %v2331_v60, 0.0  ;;  %v1119_v48 = vsel %vm1111_vm14, 1, %v1789_v43  ;;  %v1120_v49 = vsel %vm1112_vm15, 1, %v1789_v43 }
 0x956   :  { %v1097_v47 = vmax.f32 %v1095_v18, %v1096_v29  ;;  %v1121_v50 = vsel %vm1113_vm1, 1, %v1789_v43  ;;  %v1122_v51 = vsel %vm1114_vm2, 1, %v1789_v43  ;;  %v1123_v52 = vsel %vm1115_vm3, 1, %v1789_v43 }
 0x957   :  { %v1124_v1 = vsel %vm1116_vm4, 1, %v1789_v43  ;;  %v1125_v2 = vsel %vm1117_vm5, 1, %v1789_v43  ;;  %v1126_v30 = vsel %vm1118_vm6, 1, %v1789_v43  ;;  %v1127_v31 = vcombine.low %v1119_v48, %v1120_v49 }
 0x958   :  { %1098 = vmax.xlane.f32.xlu1 %v1097_v47  ;;  %v1128_v61 = vcombine.low %v1121_v50, %v1122_v51  ;;  %v1144_v62 = vcombine.low %v1123_v52, %v1124_v1  ;;  %v1145_v63 = vcombine.low %v1125_v2, %v1126_v30 }
 0x959   :  { %v1135_v0 = vrot.slane %v1127_v31, %v1819_v5 }
 0x95a   :  { %v1142_v45 = vrot.slane %v1128_v61, %v1819_v5  ;;  %v1152_v46 = vrot.slane %v1144_v62, %v1819_v5  ;;  %v1159_v3 = vrot.slane %v1145_v63, %v1819_v5 }
 0x95c   :  { %v1143_v23 = vcombine.low %v1135_v0, %v1142_v45  ;;  %v1160_v24 = vcombine.low %v1152_v46, %v1159_v3 }
 0x95e   :  { %vm1161_vm7 = vcmp.ne.s32.totalorder %v1143_v23, 0  ;;  %vm1162_vm10 = vcmp.ne.s32.totalorder %v1160_v24, 0 }
 0x9e5   :  { %v1099_v25 = vpop.xlane.xlu1 %1098 }
 0x9e6   :  { %v1107_v26 = vrot.slane %v1099_v25, %v1910_v54 }
 0x9e8   :  { %vm1109_vm8 = vcmp.eq.f32.partialorder %v1821_v8, %v1107_v26  ;;  %vm1110_vm9 = vcmp.eq.f32.partialorder %v1823_v9, %v1107_v26 }
 0x9e9   :  { %vm1163_vm11 = vmand %vm1109_vm8, %vm1161_vm7 }
 0x9ea   :  { %vm1164_vm12 = vmand %vm1110_vm9, %vm1162_vm10  ;;  %v1165_v27 = vsel %vm1163_vm11, %v1912_v55, 1024 }
 0x9eb   :  { %v1166_v28 = vsel %vm1164_vm12, %v1914_v56, 1024  ;;  %v1167_v57 = vcombine.high %v1165_v27, %v1165_v27  ;;  %v1174_v59 = vrot.slane %v1165_v27, %v1819_v5 }
 0x9ec   :  { %v1184_v4 = vcombine.high %v1166_v28, %v1166_v28  ;;  %v1191_v6 = vrot.slane %v1166_v28, %v1819_v5 }
 0x9ed   :  { %v1181_v7 = vrot.slane %v1167_v57, %v1819_v5  ;;  %v1182_v10 = vcombine.high %v1174_v59, %v1174_v59  ;;  %v1201_v12 = vsel %vm72_vm0, %v1174_v59, 2147483647 }
 0x9ee   :  { %v1198_v18 = vrot.slane %v1184_v4, %v1819_v5  ;;  %v1199_v29 = vcombine.high %v1191_v6, %v1191_v6  ;;  %v1205_v47 = vsel %vm72_vm0, %v1191_v6, 2147483647 }
 0x9ef   :  { %v1183_v48 = vcombine.high %v1181_v7, %v1181_v7  ;;  %v1202_v49 = vsel %vm72_vm0, %v1182_v10, 2147483647  ;;  %v1203_v50 = vsel %vm72_vm0, %v1181_v7, 2147483647  ;;  %vm1206_vm13 = vcmp.lt.s32.totalorder %v1201_v12, %v1205_v47 }
 0x9f0   :  { %v1200_v51 = vcombine.high %v1198_v18, %v1198_v18  ;;  %v1208_v52 = vsel %vm72_vm0, %v1199_v29, 2147483647  ;;  %v1211_v1 = vsel %vm72_vm0, %v1198_v18, 2147483647  ;;  %v1207_v30 = vsel %vm1206_vm13, %v1201_v12, %v1205_v47 }
 0x9f1   :  { %v1204_v2 = vsel %vm72_vm0, %v1183_v48, 2147483647  ;;  %vm1209_vm14 = vcmp.lt.s32.totalorder %v1202_v49, %v1208_v52  ;;  %vm1212_vm15 = vcmp.lt.s32.totalorder %v1203_v50, %v1211_v1 }
 0x9f2   :  { %v1210_v31 = vsel %vm1209_vm14, %v1202_v49, %v1208_v52  ;;  %v1214_v61 = vsel %vm72_vm0, %v1200_v51, 2147483647  ;;  %v1213_v62 = vsel %vm1212_vm15, %v1203_v50, %v1211_v1 }
 0x9f3   :  { %vm1215_vm1 = vcmp.lt.s32.totalorder %v1204_v2, %v1214_v61  ;;  %vm1217_vm2 = vcmp.lt.s32.totalorder %v1207_v30, %v1210_v31 }
 0x9f4   :  { %v1216_v63 = vsel %vm1215_vm1, %v1204_v2, %v1214_v61  ;;  %v1218_v0 = vsel %vm1217_vm2, %v1207_v30, %v1210_v31 }
 0x9f5   :  { %vm1219_vm3 = vcmp.lt.s32.totalorder %v1213_v62, %v1216_v63 }
 0x9f6   :  { %v1220_v45 = vsel %vm1219_vm3, %v1213_v62, %v1216_v63 }
 0x9f7   :  { %vm1221_vm4 = vcmp.lt.s32.totalorder %v1218_v0, %v1220_v45 }
 0x9f8   :  { %v1222_v46 = vsel %vm1221_vm4, %v1218_v0, %v1220_v45 }
 0x9f9   :  { %v1224_v3 = vshra.s32 %v1222_v46, 16  ;;  %v1223_v24 = vand.u32 65535, %v1222_v46 }
 0x9fb   :  { %v1226_v23 = vcvt.s32.f32 %v1224_v3  ;;  %v1225_v26 = vcvt.s32.f32 %v1223_v24 }
 0x9fd   :  { %1227 = vmin.xlane.f32.xlu0 %v1226_v23 }
 0xa8a   :  { %v1228_v25 = vpop.xlane.xlu0 %1227 }
 0xa8b   :  { %vm1229_vm5 = vcmp.eq.f32.partialorder %v1226_v23, %v1228_v25  ;;  %v1234_v28 = vcvt.f32.s32 %v1228_v25 }
 0xa8c   :  { %v1230_v27 = vsel %vm1229_vm5, %v1225_v26, inf }
 0xa8d   :  { %1231 = vmin.xlane.f32.xlu1 %v1230_v27  ;;  %v1235_v59 = vshll.u32 %v1234_v28, 16 }
 0xb1a   :  { %v1232_v57 = vpop.xlane.xlu1 %1231 }
 0xb1b   :  { %v1233_v4 = vcvt.f32.s32 %v1232_v57 }
 0xb1d   :  { %v1236_v6 = vadd.s32 %v1235_v59, %v1233_v4 }
 0xb1f   :  { %vm1237_vm6 = vcmp.eq.s32.totalorder %v1875_v35, %v1236_v6  ;;  %vm1238_vm7 = vcmp.eq.s32.totalorder %v1878_v36, %v1236_v6  ;;  %vm1239_vm8 = vcmp.eq.s32.totalorder %v1881_v37, %v1236_v6  ;;  %vm1240_vm9 = vcmp.eq.s32.totalorder %v1884_v38, %v1236_v6 }
 0xb20   :  { %vm1241_vm10 = vcmp.eq.s32.totalorder %v1887_v39, %v1236_v6  ;;  %vm1242_vm11 = vcmp.eq.s32.totalorder %v1890_v40, %v1236_v6  ;;  %vm1243_vm12 = vcmp.eq.s32.totalorder %v1893_v41, %v1236_v6  ;;  %vm1244_vm13 = vcmp.eq.s32.totalorder %v1896_v42, %v1236_v6 }
 0xb21   :  { %v2403_v7 = vsel %vm1237_vm6, 1.0, %v2310_v32  ;;  %v2406_v10 = vsel %vm1238_vm7, 1.0, %v2313_v33  ;;  %v2409_v12 = vsel %vm1239_vm8, 1.0, %v2316_v34  ;;  %v2412_v18 = vsel %vm1240_vm9, 1.0, %v2319_v44 }
 0xb22   :  { %v2415_v29 = vsel %vm1241_vm10, 1.0, %v2322_v53  ;;  %v2418_v47 = vsel %vm1242_vm11, 1.0, %v2325_v19  ;;  %v2421_v48 = vsel %vm1243_vm12, 1.0, %v2328_v22  ;;  %v2424_v32 = vsel %vm1244_vm13, 1.0, %v2331_v60 }
 0xb23   :  { %vm1253_vm14 = vcmp.gt.f32.partialorder %v2403_v7, 0.0  ;;  %vm1254_vm15 = vcmp.gt.f32.partialorder %v2406_v10, 0.0  ;;  %vm1255_vm1 = vcmp.gt.f32.partialorder %v2409_v12, 0.0  ;;  %vm1256_vm2 = vcmp.gt.f32.partialorder %v2412_v18, 0.0 }
 0xb24   :  { %vm1257_vm3 = vcmp.gt.f32.partialorder %v2415_v29, 0.0  ;;  %vm1258_vm4 = vcmp.gt.f32.partialorder %v2418_v47, 0.0  ;;  %vm1259_vm5 = vcmp.gt.f32.partialorder %v2421_v48, 0.0  ;;  %vm1260_vm6 = vcmp.gt.f32.partialorder %v2424_v32, 0.0 }
 0xb25   :  { %v1261_v33 = vsel %vm1253_vm14, -inf, %v1829_v11  ;;  %v1262_v34 = vsel %vm1254_vm15, -inf, %v1842_v15  ;;  %v1263_v44 = vsel %vm1255_vm1, -inf, %v1838_v14  ;;  %v1264_v53 = vsel %vm1256_vm2, -inf, %v1857_v20 }
 0xb26   :  { %v1265_v19 = vsel %vm1257_vm3, -inf, %v1835_v13  ;;  %v1266_v22 = vsel %vm1258_vm4, -inf, %v1849_v17  ;;  %v1267_v60 = vsel %vm1259_vm5, -inf, %v1845_v16  ;;  %v1268_v49 = vsel %vm1260_vm6, -inf, %v1861_v21 }
 0xb27   :  { %v1269_v50 = vsel %vm72_vm0, %v1261_v33, -inf  ;;  %v1270_v51 = vsel %vm72_vm0, %v1262_v34, -inf  ;;  %v1271_v52 = vsel %vm72_vm0, %v1263_v44, -inf  ;;  %v1272_v1 = vsel %vm72_vm0, %v1264_v53, -inf }
 0xb28   :  { %v1273_v2 = vsel %vm72_vm0, %v1265_v19, -inf  ;;  %v1275_v30 = vsel %vm72_vm0, %v1266_v22, -inf  ;;  %v1277_v31 = vsel %vm72_vm0, %v1267_v60, -inf  ;;  %v1279_v61 = vsel %vm72_vm0, %v1268_v49, -inf }
 0xb29   :  { %v1274_v62 = vmax.f32 %v1269_v50, %v1273_v2  ;;  %v1276_v63 = vmax.f32 %v1270_v51, %v1275_v30  ;;  %v1278_v0 = vmax.f32 %v1271_v52, %v1277_v31  ;;  %v1280_v45 = vmax.f32 %v1272_v1, %v1279_v61 }
 0xb2a   :  { %vm1297_vm7 = vcmp.eq.f32.partialorder %v2403_v7, 0.0  ;;  %vm1298_vm8 = vcmp.eq.f32.partialorder %v2406_v10, 0.0  ;;  %vm1299_vm9 = vcmp.eq.f32.partialorder %v2409_v12, 0.0  ;;  %vm1300_vm10 = vcmp.eq.f32.partialorder %v2412_v18, 0.0 }
 0xb2b   :  { %v1281_v46 = vmax.f32 %v1274_v62, %v1276_v63  ;;  %v1282_v3 = vmax.f32 %v1278_v0, %v1280_v45  ;;  %vm1301_vm11 = vcmp.eq.f32.partialorder %v2415_v29, 0.0  ;;  %vm1302_vm12 = vcmp.eq.f32.partialorder %v2418_v47, 0.0 }
 0xb2c   :  { %vm1303_vm13 = vcmp.eq.f32.partialorder %v2421_v48, 0.0  ;;  %vm1304_vm14 = vcmp.eq.f32.partialorder %v2424_v32, 0.0  ;;  %v1305_v24 = vsel %vm1297_vm7, 1, %v1789_v43  ;;  %v1306_v25 = vsel %vm1298_vm8, 1, %v1789_v43 }
 0xb2d   :  { %v1283_v23 = vmax.f32 %v1281_v46, %v1282_v3  ;;  %v1307_v26 = vsel %vm1299_vm9, 1, %v1789_v43  ;;  %v1308_v27 = vsel %vm1300_vm10, 1, %v1789_v43  ;;  %v1309_v28 = vsel %vm1301_vm11, 1, %v1789_v43 }
 0xb2e   :  { %v1310_v57 = vsel %vm1302_vm12, 1, %v1789_v43  ;;  %v1311_v59 = vsel %vm1303_vm13, 1, %v1789_v43  ;;  %v1312_v4 = vsel %vm1304_vm14, 1, %v1789_v43  ;;  %v1313_v6 = vcombine.low %v1305_v24, %v1306_v25 }
 0xb2f   :  { %1284 = vmax.xlane.f32.xlu0 %v1283_v23  ;;  %v1314_v33 = vcombine.low %v1307_v26, %v1308_v27  ;;  %v1330_v34 = vcombine.low %v1309_v28, %v1310_v57  ;;  %v1331_v44 = vcombine.low %v1311_v59, %v1312_v4 }
 0xb30   :  { %v1321_v53 = vrot.slane %v1313_v6, %v1819_v5 }
 0xb31   :  { %v1328_v19 = vrot.slane %v1314_v33, %v1819_v5  ;;  %v1338_v22 = vrot.slane %v1330_v34, %v1819_v5  ;;  %v1345_v60 = vrot.slane %v1331_v44, %v1819_v5 }
 0xb33   :  { %v1329_v49 = vcombine.low %v1321_v53, %v1328_v19  ;;  %v1346_v50 = vcombine.low %v1338_v22, %v1345_v60 }
 0xb35   :  { %vm1347_vm15 = vcmp.ne.s32.totalorder %v1329_v49, 0  ;;  %vm1348_vm3 = vcmp.ne.s32.totalorder %v1346_v50, 0 }
 0xbbc   :  { %v1285_v51 = vpop.xlane.xlu0 %1284 }
 0xbbd   :  { %v1293_v52 = vrot.slane %v1285_v51, %v1910_v54 }
 0xbbf   :  { %vm1295_vm1 = vcmp.eq.f32.partialorder %v1821_v8, %v1293_v52  ;;  %vm1296_vm2 = vcmp.eq.f32.partialorder %v1823_v9, %v1293_v52 }
 0xbc0   :  { %vm1349_vm4 = vmand %vm1295_vm1, %vm1347_vm15 }
 0xbc1   :  { %vm1350_vm5 = vmand %vm1296_vm2, %vm1348_vm3  ;;  %v1351_v1 = vsel %vm1349_vm4, %v1912_v55, 1024 }
 0xbc2   :  { %v1352_v2 = vsel %vm1350_vm5, %v1914_v56, 1024  ;;  %v1353_v30 = vcombine.high %v1351_v1, %v1351_v1  ;;  %v1360_v31 = vrot.slane %v1351_v1, %v1819_v5 }
 0xbc3   :  { %v1370_v61 = vcombine.high %v1352_v2, %v1352_v2  ;;  %v1377_v62 = vrot.slane %v1352_v2, %v1819_v5  ;;  %v99_v2 = vsub.f32 %v1821_v8, %v1917_v58 }
 0xbc4   :  { %v1367_v63 = vrot.slane %v1353_v30, %v1819_v5  ;;  %v1368_v0 = vcombine.high %v1360_v31, %v1360_v31  ;;  %v1387_v45 = vsel %vm72_vm0, %v1360_v31, 2147483647 }
 0xbc5   :  { %v1384_v46 = vrot.slane %v1370_v61, %v1819_v5  ;;  %v1385_v3 = vcombine.high %v1377_v62, %v1377_v62  ;;  %v1391_v23 = vsel %vm72_vm0, %v1377_v62, 2147483647  ;;  %v101_v30 = vmul.f32 1.442695, %v99_v2 }
 0xbc6   :  { %v1369_v24 = vcombine.high %v1367_v63, %v1367_v63  ;;  %v1388_v25 = vsel %vm72_vm0, %v1368_v0, 2147483647  ;;  %v1389_v26 = vsel %vm72_vm0, %v1367_v63, 2147483647  ;;  %vm1392_vm6 = vcmp.lt.s32.totalorder %v1387_v45, %v1391_v23 }
 0xbc7   :  { %v1386_v27 = vcombine.high %v1384_v46, %v1384_v46  ;;  %v1394_v28 = vsel %vm72_vm0, %v1385_v3, 2147483647  ;;  %v1397_v57 = vsel %vm72_vm0, %v1384_v46, 2147483647  ;;  %v1393_v4 = vsel %vm1392_vm6, %v1387_v45, %v1391_v23 }
 0xbc8   :  { %v1390_v59 = vsel %vm72_vm0, %v1369_v24, 2147483647  ;;  %vm1395_vm7 = vcmp.lt.s32.totalorder %v1388_v25, %v1394_v28  ;;  %vm1398_vm8 = vcmp.lt.s32.totalorder %v1389_v26, %v1397_v57  ;;  %1707 = vpow2.f32 %v101_v30 }
 0xbc9   :  { %v1396_v6 = vsel %vm1395_vm7, %v1388_v25, %v1394_v28  ;;  %v1400_v33 = vsel %vm72_vm0, %v1386_v27, 2147483647  ;;  %v1399_v34 = vsel %vm1398_vm8, %v1389_v26, %v1397_v57  ;;  %v100_v61 = vsub.f32 %v1823_v9, %v1917_v58 }
 0xbca   :  { %vm1401_vm9 = vcmp.lt.s32.totalorder %v1390_v59, %v1400_v33  ;;  %vm1403_vm10 = vcmp.lt.s32.totalorder %v1393_v4, %v1396_v6 }
 0xbcb   :  { %v1402_v44 = vsel %vm1401_vm9, %v1390_v59, %v1400_v33  ;;  %v1404_v53 = vsel %vm1403_vm10, %v1393_v4, %v1396_v6  ;;  %v103_v63 = vmul.f32 1.442695, %v100_v61 }
 0xbcc   :  { %vm1405_vm11 = vcmp.lt.s32.totalorder %v1399_v34, %v1402_v44 }
 0xbcd   :  { %v1406_v19 = vsel %vm1405_vm11, %v1399_v34, %v1402_v44  ;;  %1709 = vpow2.f32 %v103_v63 }
 0xbce   :  { %vm1407_vm12 = vcmp.lt.s32.totalorder %v1404_v53, %v1406_v19 }
 0xbcf   :  { %v1408_v22 = vsel %vm1407_vm12, %v1404_v53, %v1406_v19 }
 0xbd0   :  { %v1410_v60 = vshra.s32 %v1408_v22, 16  ;;  %v1409_v50 = vand.u32 65535, %v1408_v22 }
 0xbd2   :  { %v1412_v49 = vcvt.s32.f32 %v1410_v60  ;;  %v1411_v52 = vcvt.s32.f32 %v1409_v50  ;;  %v2489_v31 = vpop.eup %1707 }
 0xbd3   :  { %v114_v62 = vrot.slane %v2489_v31, %v1819_v5  ;;  %v107_v45 = vcombine.high %v2489_v31, %v2489_v31 }
 0xbd4   :  { %1413 = vmin.xlane.f32.xlu1 %v1412_v49 }
 0xbd5   :  { %v122_v0 = vcombine.high %v114_v62, %v114_v62  ;;  %v121_v3 = vrot.slane %v107_v45, %v1819_v5  ;;  %v149_v23 = vsel %vm72_vm0, %v114_v62, 0.0 }
 0xbd7   :  { %v150_v46 = vsel %vm72_vm0, %v122_v0, 0.0  ;;  %v123_v25 = vcombine.high %v121_v3, %v121_v3  ;;  %v152_v26 = vsel %vm72_vm0, %v121_v3, 0.0  ;;  %v2501_v58 = vpop.eup %1709 }
 0xbd8   :  { %v151_v24 = vadd.f32 %v150_v46, %v149_v23  ;;  %v131_v28 = vrot.slane %v2501_v58, %v1819_v5  ;;  %v124_v44 = vcombine.high %v2501_v58, %v2501_v58 }
 0xbd9   :  { %v154_v57 = vsel %vm72_vm0, %v123_v25, 0.0 }
 0xbda   :  { %v153_v27 = vadd.f32 %v152_v26, %v151_v24  ;;  %v139_v6 = vcombine.high %v131_v28, %v131_v28  ;;  %v156_v33 = vsel %vm72_vm0, %v131_v28, 0.0  ;;  %v138_v50 = vrot.slane %v124_v44, %v1819_v5 }
 0xbdc   :  { %v155_v59 = vadd.f32 %v154_v57, %v153_v27  ;;  %v140_v26 = vcombine.high %v138_v50, %v138_v50  ;;  %v160_v27 = vsel %vm72_vm0, %v138_v50, 0.0 }
 0xbde   :  { %v157_v53 = vadd.f32 %v156_v33, %v155_v59  ;;  %v162_v59 = vsel %vm72_vm0, %v140_v26, 0.0 }
 0xc61   :  { %v1414_v51 = vpop.xlane.xlu1 %1413 }
 0xc62   :  { %vm1415_vm13 = vcmp.eq.f32.partialorder %v1412_v49, %v1414_v51  ;;  %v1420_v4 = vcvt.f32.s32 %v1414_v51  ;;  %v158_v49 = vsel %vm72_vm0, %v139_v6, 0.0 }
 0xc63   :  { %v1416_v1 = vsel %vm1415_vm13, %v1411_v52, inf  ;;  %v159_v52 = vadd.f32 %v158_v49, %v157_v53 }
 0xc64   :  { %1417 = vmin.xlane.f32.xlu0 %v1416_v1  ;;  %v1421_v19 = vshll.u32 %v1420_v4, 16 }
 0xc65   :  { %v161_v57 = vadd.f32 %v160_v27, %v159_v52 }
 0xc67   :  { %v163_v4 = vadd.f32 %v162_v59, %v161_v57 }
 0xcf1   :  { %v1418_v34 = vpop.xlane.xlu0 %1417 }
 0xcf2   :  { %v1419_v22 = vcvt.f32.s32 %v1418_v34 }
 0xcf4   :  { %v1422_v60 = vadd.s32 %v1421_v19, %v1419_v22 }
 0xcf6   :  { %vm1423_vm14 = vcmp.eq.s32.totalorder %v1875_v35, %v1422_v60  ;;  %vm1424_vm15 = vcmp.eq.s32.totalorder %v1878_v36, %v1422_v60  ;;  %vm1425_vm1 = vcmp.eq.s32.totalorder %v1881_v37, %v1422_v60  ;;  %vm1426_vm2 = vcmp.eq.s32.totalorder %v1884_v38, %v1422_v60 }
 0xcf7   :  { %vm1427_vm3 = vcmp.eq.s32.totalorder %v1887_v39, %v1422_v60  ;;  %vm1428_vm4 = vcmp.eq.s32.totalorder %v1890_v40, %v1422_v60  ;;  %vm1429_vm5 = vcmp.eq.s32.totalorder %v1893_v41, %v1422_v60  ;;  %vm1430_vm6 = vcmp.eq.s32.totalorder %v1896_v42, %v1422_v60 }
 0xcf8   :  { %v2520_v51 = vsel %vm1423_vm14, 1.0, %v2403_v7  ;;  %v2523_v1 = vsel %vm1424_vm15, 1.0, %v2406_v10  ;;  %v2526_v2 = vsel %vm1425_vm1, 1.0, %v2409_v12  ;;  %v2529_v30 = vsel %vm1426_vm2, 1.0, %v2412_v18 }
 0xcf9   :  { %v2532_v61 = vsel %vm1427_vm3, 1.0, %v2415_v29  ;;  %v2535_v62 = vsel %vm1428_vm4, 1.0, %v2418_v47  ;;  %v2538_v63 = vsel %vm1429_vm5, 1.0, %v2421_v48  ;;  %v2541_v7 = vsel %vm1430_vm6, 1.0, %v2424_v32 }
 0xcfa   :  { %vm1439_vm7 = vcmp.gt.f32.partialorder %v2520_v51, 0.0  ;;  %vm1440_vm8 = vcmp.gt.f32.partialorder %v2523_v1, 0.0  ;;  %vm1441_vm9 = vcmp.gt.f32.partialorder %v2526_v2, 0.0  ;;  %vm1442_vm10 = vcmp.gt.f32.partialorder %v2529_v30, 0.0 }
 0xcfb   :  { %vm1443_vm11 = vcmp.gt.f32.partialorder %v2532_v61, 0.0  ;;  %vm1444_vm12 = vcmp.gt.f32.partialorder %v2535_v62, 0.0  ;;  %vm1445_vm13 = vcmp.gt.f32.partialorder %v2538_v63, 0.0  ;;  %vm1446_vm14 = vcmp.gt.f32.partialorder %v2541_v7, 0.0 }
 0xcfc   :  { %v1447_v10 = vsel %vm1439_vm7, -inf, %v1829_v11  ;;  %v1448_v12 = vsel %vm1440_vm8, -inf, %v1842_v15  ;;  %v1449_v18 = vsel %vm1441_vm9, -inf, %v1838_v14  ;;  %v1450_v29 = vsel %vm1442_vm10, -inf, %v1857_v20 }
 0xcfd   :  { %v1451_v47 = vsel %vm1443_vm11, -inf, %v1835_v13  ;;  %v1452_v48 = vsel %vm1444_vm12, -inf, %v1849_v17  ;;  %v1453_v32 = vsel %vm1445_vm13, -inf, %v1845_v16  ;;  %v1454_v0 = vsel %vm1446_vm14, -inf, %v1861_v21 }
 0xcfe   :  { %v1455_v45 = vsel %vm72_vm0, %v1447_v10, -inf  ;;  %v1456_v46 = vsel %vm72_vm0, %v1448_v12, -inf  ;;  %v1457_v11 = vsel %vm72_vm0, %v1449_v18, -inf  ;;  %v1458_v15 = vsel %vm72_vm0, %v1450_v29, -inf }
 0xcff   :  { %v1459_v14 = vsel %vm72_vm0, %v1451_v47, -inf  ;;  %v1461_v20 = vsel %vm72_vm0, %v1452_v48, -inf  ;;  %v1463_v13 = vsel %vm72_vm0, %v1453_v32, -inf  ;;  %v1465_v17 = vsel %vm72_vm0, %v1454_v0, -inf }
 0xd00   :  { %v1460_v3 = vmax.f32 %v1455_v45, %v1459_v14  ;;  %v1462_v16 = vmax.f32 %v1456_v46, %v1461_v20  ;;  %v1464_v23 = vmax.f32 %v1457_v11, %v1463_v13  ;;  %v1466_v21 = vmax.f32 %v1458_v15, %v1465_v17 }
 0xd01   :  { %vm1483_vm15 = vcmp.eq.f32.partialorder %v2520_v51, 0.0  ;;  %vm1484_vm1 = vcmp.eq.f32.partialorder %v2523_v1, 0.0  ;;  %vm1485_vm2 = vcmp.eq.f32.partialorder %v2526_v2, 0.0  ;;  %vm1486_vm3 = vcmp.eq.f32.partialorder %v2529_v30, 0.0 }
 0xd02   :  { %v1467_v24 = vmax.f32 %v1460_v3, %v1462_v16  ;;  %v1468_v25 = vmax.f32 %v1464_v23, %v1466_v21  ;;  %vm1487_vm4 = vcmp.eq.f32.partialorder %v2532_v61, 0.0  ;;  %vm1488_vm5 = vcmp.eq.f32.partialorder %v2535_v62, 0.0 }
 0xd03   :  { %vm1489_vm6 = vcmp.eq.f32.partialorder %v2538_v63, 0.0  ;;  %vm1490_vm7 = vcmp.eq.f32.partialorder %v2541_v7, 0.0  ;;  %v1491_v6 = vsel %vm1483_vm15, 1, %v1789_v43  ;;  %v1492_v33 = vsel %vm1484_vm1, 1, %v1789_v43 }
 0xd04   :  { %v1469_v28 = vmax.f32 %v1467_v24, %v1468_v25  ;;  %v1493_v34 = vsel %vm1485_vm2, 1, %v1789_v43  ;;  %v1494_v44 = vsel %vm1486_vm3, 1, %v1789_v43  ;;  %v1495_v53 = vsel %vm1487_vm4, 1, %v1789_v43 }
 0xd05   :  { %v1496_v19 = vsel %vm1488_vm5, 1, %v1789_v43  ;;  %v1497_v22 = vsel %vm1489_vm6, 1, %v1789_v43  ;;  %v1498_v60 = vsel %vm1490_vm7, 1, %v1789_v43  ;;  %v1499_v49 = vcombine.low %v1491_v6, %v1492_v33 }
 0xd06   :  { %1470 = vmax.xlane.f32.xlu1 %v1469_v28  ;;  %v1500_v50 = vcombine.low %v1493_v34, %v1494_v44  ;;  %v1516_v52 = vcombine.low %v1495_v53, %v1496_v19  ;;  %v1517_v10 = vcombine.low %v1497_v22, %v1498_v60 }
 0xd07   :  { %v1507_v12 = vrot.slane %v1499_v49, %v1819_v5 }
 0xd08   :  { %v1514_v18 = vrot.slane %v1500_v50, %v1819_v5  ;;  %v1524_v29 = vrot.slane %v1516_v52, %v1819_v5  ;;  %v1531_v47 = vrot.slane %v1517_v10, %v1819_v5 }
 0xd0a   :  { %164 = vadd.xlane.f32.xlu1 %v163_v4  ;;  %v1515_v48 = vcombine.low %v1507_v12, %v1514_v18  ;;  %v1532_v32 = vcombine.low %v1524_v29, %v1531_v47 }
 0xd0c   :  { %vm1533_vm8 = vcmp.ne.s32.totalorder %v1515_v48, 0  ;;  %vm1534_vm11 = vcmp.ne.s32.totalorder %v1532_v32, 0 }
 0xd93   :  { %v1471_v0 = vpop.xlane.xlu1 %1470 }
 0xd94   :  { %v1479_v45 = vrot.slane %v1471_v0, %v1910_v54 }
 0xd96   :  { %vm1481_vm9 = vcmp.eq.f32.partialorder %v1821_v8, %v1479_v45  ;;  %vm1482_vm10 = vcmp.eq.f32.partialorder %v1823_v9, %v1479_v45 }
 0xd97   :  { %vm1535_vm12 = vmand %vm1481_vm9, %vm1533_vm8  ;;  %v165_v43 = vpop.xlane.xlu1 %164 }
 0xd98   :  { %vm1536_vm13 = vmand %vm1482_vm10, %vm1534_vm11  ;;  %v1537_v46 = vsel %vm1535_vm12, %v1912_v55, 1024  ;;  %1711 = vrcp.f32 %v165_v43 }
 0xd99   :  { %v1538_v11 = vsel %vm1536_vm13, %v1914_v56, 1024  ;;  %v1539_v15 = vcombine.high %v1537_v46, %v1537_v46  ;;  %v1546_v14 = vrot.slane %v1537_v46, %v1819_v5 }
 0xd9a   :  { %v1556_v20 = vcombine.high %v1538_v11, %v1538_v11  ;;  %v1563_v13 = vrot.slane %v1538_v11, %v1819_v5 }
 0xd9b   :  { %v1553_v17 = vrot.slane %v1539_v15, %v1819_v5  ;;  %v1554_v8 = vcombine.high %v1546_v14, %v1546_v14  ;;  %v1573_v9 = vsel %vm72_vm0, %v1546_v14, 2147483647 }
 0xd9c   :  { %v1570_v3 = vrot.slane %v1556_v20, %v1819_v5  ;;  %v1571_v16 = vcombine.high %v1563_v13, %v1563_v13  ;;  %v1577_v23 = vsel %vm72_vm0, %v1563_v13, 2147483647 }
 0xd9d   :  { %v1555_v55 = vcombine.high %v1553_v17, %v1553_v17  ;;  %v1574_v21 = vsel %vm72_vm0, %v1554_v8, 2147483647  ;;  %v1575_v56 = vsel %vm72_vm0, %v1553_v17, 2147483647  ;;  %vm1578_vm14 = vcmp.lt.s32.totalorder %v1573_v9, %v1577_v23 }
 0xd9e   :  { %v1572_v24 = vcombine.high %v1570_v3, %v1570_v3  ;;  %v1580_v25 = vsel %vm72_vm0, %v1571_v16, 2147483647  ;;  %v1583_v26 = vsel %vm72_vm0, %v1570_v3, 2147483647  ;;  %v1579_v28 = vsel %vm1578_vm14, %v1573_v9, %v1577_v23 }
 0xd9f   :  { %v1576_v27 = vsel %vm72_vm0, %v1555_v55, 2147483647  ;;  %vm1581_vm15 = vcmp.lt.s32.totalorder %v1574_v21, %v1580_v25  ;;  %vm1584_vm1 = vcmp.lt.s32.totalorder %v1575_v56, %v1583_v26 }
 0xda0   :  { %v1582_v57 = vsel %vm1581_vm15, %v1574_v21, %v1580_v25  ;;  %v1586_v59 = vsel %vm72_vm0, %v1572_v24, 2147483647  ;;  %v1585_v6 = vsel %vm1584_vm1, %v1575_v56, %v1583_v26 }
 0xda1   :  { %vm1587_vm2 = vcmp.lt.s32.totalorder %v1576_v27, %v1586_v59  ;;  %vm1589_vm3 = vcmp.lt.s32.totalorder %v1579_v28, %v1582_v57 }
 0xda2   :  { %v1712_v4 = vpop.eup %1711  ;;  %v1588_v33 = vsel %vm1587_vm2, %v1576_v27, %v1586_v59  ;;  %v1590_v44 = vsel %vm1589_vm3, %v1579_v28, %v1582_v57 }
 0xda3   :  { %v167_v34 = vmul.f32 9.6, %v1712_v4  ;;  %vm1591_vm4 = vcmp.lt.s32.totalorder %v1585_v6, %v1588_v33 }
 0xda4   :  { %v1592_v53 = vsel %vm1591_vm4, %v1585_v6, %v1588_v33 }
 0xda5   :  { %v175_v19 = vrot.slane %v167_v34, %v1910_v54  ;;  %vm1593_vm5 = vcmp.lt.s32.totalorder %v1590_v44, %v1592_v53 }
 0xda6   :  { %v1594_v22 = vsel %vm1593_vm5, %v1590_v44, %v1592_v53 }
 0xda7   :  { %v177_v60 = vmul.f32 %v2489_v31, %v175_v19  ;;  %v178_v49 = vmul.f32 %v2501_v58, %v175_v19  ;;  %v1596_v50 = vshra.s32 %v1594_v22, 16  ;;  %v1595_v32 = vand.u32 65535, %v1594_v22 }
 0xda9   :  { %v1598_v52 = vcvt.s32.f32 %v1596_v50  ;;  %v179_v10 = vadd.f32 -0.1, %v177_v60  ;;  %v180_v12 = vadd.f32 -0.1, %v178_v49  ;;  %v1597_v54 = vcvt.s32.f32 %v1595_v32 }
 0xdab   :  { %1599 = vmin.xlane.f32.xlu0 %v1598_v52  ;;  %v181_v18 = vmax.f32 %v179_v10, 0.0  ;;  %v182_v29 = vmax.f32 %v180_v12, 0.0 }
 0xdad   :  { %v183_v47 = vmin.f32 %v181_v18, 1.0  ;;  %v184_v48 = vmin.f32 %v182_v29, 1.0 }
 0xdaf   :  { %185 = vst [vmem:[#allocation6] sm:$0xff] %v183_v47  ;;  %186 = vst [vmem:[#allocation6 + $0x8] sm:$0xff] %v184_v48 }
 0xe38   :  { %v1600_v0 = vpop.xlane.xlu0 %1599 }
 0xe39   :  { %vm1601_vm0 = vcmp.eq.f32.partialorder %v1598_v52, %v1600_v0 }
 0xe3a   :  { %v1602_v45 = vsel %vm1601_vm0, %v1597_v54, inf }
 0xe3b   :  { %1603 = vmin.xlane.f32.xlu0 %v1602_v45 }
 0xe3c   :  { %1746 = shalt.err (!%p1743_p12)
}
 0xe3d   :  { %s1747_s25 = scalar_lea.hbm %s2655_s2, 256 }
 0xe3e   :  { %p1748_p13 = scmp.ne.s32.totalorder %s2655_s2, %s1747_s25  ;;  %p1751_p0 = scmp.lt.u32.totalorder %s1747_s25, %s2655_s2 }
 0xe40   :  { %p1753_p1 = pnand %p1751_p0, %p1748_p13 }
 0xe42   :  { %1756 = shalt.err (!%p1753_p1)
}
 0xe43   :  { %1690 = dma.vmem_to_hbm [thread:$0]  %s1688_s21, 256, %s2655_s2, [#allocation7]   ;;  %v1606_v31 = vcvt.f32.s32 %v1600_v0 }
 0xe44   :  { %s1791_s2 = smov [#allocation5]  }
 0xe45   :  { %v1607_v43 = vshll.u32 %v1606_v31, 16  ;;  %s1677_s4 = sshll.u32 %s1791_s2, 4  ;;  %s1678_s4 = int_to_ptr.vmem [resolvable:$true] %s1677_s4 }
 0xe46   :  { %s1757_s5 = scalar_lea.vmem %s1678_s4, 256  ;;  %p1762_p3 = scmp.lt.s32.totalorder %s1678_s4, %s1678_s4 }
 0xe47   :  { %p1758_p2 = scmp.ne.s32.totalorder %s1678_s4, %s1757_s5  ;;  %p1763_p4 = scmp.lt.s32.totalorder %s1757_s5, %s1757_s5 }
 0xe49   :  { %p1764_p5 = por %p1763_p4, %p1762_p3 }
 0xe4b   :  { %p1765_p6 = pnand %p1764_p5, %p1758_p2 }
 0xec8   :  { %v1604_v58 = vpop.xlane.xlu0 %1603 }
 0xec9   :  { %v1605_v46 = vcvt.f32.s32 %v1604_v58 }
 0xecb   :  { %v1608_v11 = vadd.s32 %v1607_v43, %v1605_v46 }
 0xecd   :  { %vm1609_vm6 = vcmp.eq.s32.totalorder %v1875_v35, %v1608_v11  ;;  %vm1610_vm7 = vcmp.eq.s32.totalorder %v1878_v36, %v1608_v11  ;;  %vm1611_vm8 = vcmp.eq.s32.totalorder %v1881_v37, %v1608_v11  ;;  %vm1612_vm9 = vcmp.eq.s32.totalorder %v1884_v38, %v1608_v11 }
 0xece   :  { %vm1613_vm10 = vcmp.eq.s32.totalorder %v1887_v39, %v1608_v11  ;;  %vm1614_vm11 = vcmp.eq.s32.totalorder %v1890_v40, %v1608_v11  ;;  %vm1615_vm12 = vcmp.eq.s32.totalorder %v1893_v41, %v1608_v11  ;;  %vm1616_vm13 = vcmp.eq.s32.totalorder %v1896_v42, %v1608_v11 }
 0xecf   :  { %v1617_v15 = vsel %vm1609_vm6, 1.0, %v2520_v51  ;;  %v1618_v14 = vsel %vm1610_vm7, 1.0, %v2523_v1  ;;  %v1619_v35 = vsel %vm1611_vm8, 1.0, %v2526_v2  ;;  %v1620_v36 = vsel %vm1612_vm9, 1.0, %v2529_v30 }
 0xed0   :  { %v1621_v37 = vsel %vm1613_vm10, 1.0, %v2532_v61  ;;  %v1622_v38 = vsel %vm1614_vm11, 1.0, %v2535_v62  ;;  %v1623_v39 = vsel %vm1615_vm12, 1.0, %v2538_v63  ;;  %v1624_v40 = vsel %vm1616_vm13, 1.0, %v2541_v7 }
 0xed1   :  { %v1633_v20 = vcombine.low %v1617_v15, %v1618_v14  ;;  %v1634_v41 = vcombine.low %v1619_v35, %v1620_v36  ;;  %v1650_v13 = vcombine.low %v1621_v37, %v1622_v38  ;;  %v1651_v42 = vcombine.low %v1623_v39, %v1624_v40 }
 0xed3   :  { %v1641_v51 = vrot.slane %v1633_v20, %v1819_v5  ;;  %v1648_v1 = vrot.slane %v1634_v41, %v1819_v5  ;;  %v1658_v2 = vrot.slane %v1650_v13, %v1819_v5  ;;  %v1665_v30 = vrot.slane %v1651_v42, %v1819_v5 }
 0xed5   :  { %v1649_v61 = vcombine.low %v1641_v51, %v1648_v1  ;;  %v1666_v62 = vcombine.low %v1658_v2, %v1665_v30 }
 0xed7   :  { %1669 = vst [vmem:[#allocation5] sm:$0xff] %v1649_v61  ;;  %1670 = vst [vmem:[#allocation5 + $0x8] sm:$0xff] %v1666_v62 }
 0xed8   :  { %1768 = shalt.err (!%p1765_p6)
}
 0xed9   :  { %s1769_s8 = scalar_lea.hbm %s2654_s1, 256 }
 0xeda   :  { %p1770_p7 = scmp.ne.s32.totalorder %s2654_s1, %s1769_s8  ;;  %p1773_p8 = scmp.lt.u32.totalorder %s1769_s8, %s2654_s1 }
 0xedc   :  { %p1775_p9 = pnand %p1773_p8, %p1770_p7 }
 0xede   :  { %1778 = shalt.err (!%p1775_p9)
}
 0xedf   :  { %1680 = dma.vmem_to_hbm [thread:$0]  %s1678_s4, 256, %s2654_s1, [#allocation4]  }
 0xee0   :  { %1781 = dma.done.wait [#allocation4], 256  }
 0xee1   :  { %1782 = vsyncadd [#allocation4], 4294967040 }
 0xee2   :  { %1783 = dma.done.wait [#allocation7], 256  }
 0xee3   :  { %1784 = vsyncadd [#allocation7], 4294967040 }
 0xee4   :  { %1697 = vsyncpa [#allocation3], 1 }
 0xee5   :  { %1698 = vsyncpa [#allocation4], 1 }
 0xee6   :  { %1699 = vsyncpa [#allocation7], 1 }

</bundles_post_ra>
